<compile_context>
chip_gen: v5e
topology: v5e:2x2
jax: 0.10.0
libtpu: 0.0.40
codegen_flags: <defaults>
</compile_context>

<pallas_src>
import functools
import math
import numpy as np
import jax
import jax.numpy as jnp
from jax import lax
from jax.experimental import pallas as pl
from jax.experimental.pallas import tpu as pltpu


def _round_up(x, m):
    return ((x + m - 1) // m) * m


def _nearest_src_indices_np(in_size, out_size):
    """Host-side int32 nearest-neighbor source indices (torch 'nearest', f32 math)."""
    scale = np.float32(in_size) / np.float32(out_size)
    return np.minimum(
        np.floor(np.arange(out_size, dtype=np.float32) * scale).astype(np.int32),
        np.int32(in_size - 1),
    )


# ----------------------------- kernel -----------------------------

def _resize_kernel(rsrc_ref, csrc_ref, img_ref, o_ref, stage_ref, *,
                   nb, h, w, h_out, w_out, rows_first):
    # rsrc_ref : (H_out, 1) int32   row source indices (resident across steps)
    # csrc_ref : (1, W_out) int32   col source indices (resident across steps)
    # img_ref  : (Nb, H, W) uint8   mask chunk for this grid step
    # o_ref    : (Nb, H_out, W_out) uint8
    # stage_ref: (Nb*H_out, W) f32  [rows_first]  or  (Nb*H, W) f32 [cols_first]

    # One-hot gather matrices from precomputed integer indices (single compare).
    row_iota = lax.broadcasted_iota(jnp.int32, (h_out, h), 1)
    r = jnp.where(row_iota == rsrc_ref[...], 1.0, 0.0).astype(jnp.bfloat16)    # (H_out, H)
    col_iota = lax.broadcasted_iota(jnp.int32, (w, w_out), 0)
    ct = jnp.where(col_iota == csrc_ref[...], 1.0, 0.0).astype(jnp.bfloat16)   # (W, W_out)

    if rows_first:
        # Row gather per mask (small dots), column gather batched over the chunk.
        img = img_ref[...].astype(jnp.float32).astype(jnp.bfloat16)            # (Nb, H, W)
        for i in range(nb):
            stage_ref[pl.ds(i * h_out, h_out), :] = jnp.dot(
                r, img[i], preferred_element_type=jnp.float32)                 # (H_out, W)
        out = jnp.dot(stage_ref[...].astype(jnp.bfloat16), ct,
                      preferred_element_type=jnp.float32)                      # (Nb*H_out, W_out)
        for i in range(nb):
            o_ref[i] = out[i * h_out:(i + 1) * h_out, :].astype(jnp.uint8)
    else:
        # Column gather batched over the chunk, row gather per mask.
        img = img_ref[...].astype(jnp.float32)                                 # (Nb, H, W)
        for i in range(nb):
            stage_ref[pl.ds(i * h, h), :] = img[i]
        cols = jnp.dot(stage_ref[...].astype(jnp.bfloat16), ct,
                       preferred_element_type=jnp.float32)                     # (Nb*H, W_out)
        for i in range(nb):
            o_ref[i] = jnp.dot(
                r, cols[i * h:(i + 1) * h, :].astype(jnp.bfloat16),
                preferred_element_type=jnp.float32).astype(jnp.uint8)


# ----------------------------- wrapper -----------------------------

_MAX_UNROLL = 32   # cap per-step mask count (bounds compile time / live ranges)


def _vmem_budget_bytes():
    try:
        cap = int(pltpu.get_tpu_info().vmem_capacity_bytes)
    except Exception:
        cap = 64 << 20          # assume the smallest generation (v7x per-TC)
    # <= ~1/3 of physical VMEM, never above 40 MiB -> safe on all generations.
    return int(min(max(cap // 3, 16 << 20), 40 << 20))


def _per_mask_vmem_bytes(h, w, h_out, w_out):
    return (2 * h * w                     # double-buffered u8 input block
            + 2 * h_out * w_out           # double-buffered u8 output block
            + 6 * h * w                   # f32 + bf16 cast of the chunk
            + 6 * max(h_out * w, h * w_out)   # staging + bf16 read-back
            + 4 * h_out * w_out)          # final f32 result


def pallas_nearest_resize(image_u8, h_out, w_out):
    """Nearest-neighbor resize of a uint8 mask stack (N, H, W) -> (N, h_out, w_out)."""
    n, h, w = (int(s) for s in image_u8.shape)
    h_out, w_out = int(h_out), int(w_out)

    per_mask = max(_per_mask_vmem_bytes(h, w, h_out, w_out), 1)
    budget = _vmem_budget_bytes()
    nb = int(max(1, min(n, _MAX_UNROLL, budget // per_mask)))

    # MAC-count driven gather order: apply the shrinking dimension first.
    macs_rows_first = h_out * h * w + h_out * w * w_out
    macs_cols_first = h * w * w_out + h_out * h * w_out
    rows_first = macs_rows_first <= macs_cols_first

    n_pad = _round_up(n, nb)
    if n_pad != n:
        image_u8 = jnp.pad(image_u8, ((0, n_pad - n), (0, 0), (0, 0)))

    row_src = jnp.asarray(_nearest_src_indices_np(h, h_out).reshape(h_out, 1))
    col_src = jnp.asarray(_nearest_src_indices_np(w, w_out).reshape(1, w_out))

    stage_rows = nb * h_out if rows_first else nb * h
    kernel = functools.partial(
        _resize_kernel,
        nb=nb, h=h, w=w, h_out=h_out, w_out=w_out, rows_first=rows_first)

    fixed_bytes = 2 * (h_out * h + w * w_out) + 4 * (h_out + w_out)
    vmem_limit = int(min(48 << 20,
                         max(16 << 20, nb * per_mask + fixed_bytes + (2 << 20))))

    out = pl.pallas_call(
        kernel,
        out_shape=jax.ShapeDtypeStruct((n_pad, h_out, w_out), jnp.uint8),
        grid=(n_pad // nb,),
        in_specs=[
            pl.BlockSpec((h_out, 1), lambda i: (0, 0)),      # row src idx (resident)
            pl.BlockSpec((1, w_out), lambda i: (0, 0)),      # col src idx (resident)
            pl.BlockSpec((nb, h, w), lambda i: (i, 0, 0)),   # mask chunk
        ],
        out_specs=pl.BlockSpec((nb, h_out, w_out), lambda i: (i, 0, 0)),
        scratch_shapes=[pltpu.VMEM((stage_rows, w), jnp.float32)],
        compiler_params=pltpu.CompilerParams(
            dimension_semantics=("parallel",),   # megacore on v7x; no-op on v5e/v6e
            vmem_limit_bytes=vmem_limit),
    )(row_src, col_src, image_u8)

    return out[:n] if n_pad != n else out


# ----------------------------- module port -----------------------------

class RdMaskTransformPallas:
    """Pallas port of RdMaskTransform (no learned parameters; min/max size config only)."""

    def __init__(self, min_size, max_size):
        if not isinstance(min_size, (list, tuple)):
            min_size = (min_size,)
        self.min_size = min_size
        self.max_size = max_size

    def __call__(self, sub_inputs, obj_inputs):
        person_image_list = self.process_inputs(sub_inputs)
        obj_image_list = self.process_inputs(obj_inputs)
        return (person_image_list, obj_image_list)

    def _output_size(self, h, w):
        # Mirrors torch: scale_factor clamped by max_size, then
        # F.interpolate(..., recompute_scale_factor=True) -> out = floor(in * scale).
        self_min_size = float(self.min_size[-1])
        self_max_size = float(self.max_size)
        min_sz = float(min(h, w))
        max_sz = float(max(h, w))
        scale_factor = self_min_size / min_sz
        if max_sz * scale_factor > self_max_size:
            scale_factor = self_max_size / max_sz
        return int(math.floor(h * scale_factor)), int(math.floor(w * scale_factor))

    def process_inputs(self, image_batch):
        # Bucket same-(H, W) mask stacks into a single pallas_call: concatenate along
        # the mask axis, resize once, split the results back (one dispatch per shape).
        buckets = {}
        for idx, img in enumerate(image_batch):
            h, w = int(img.shape[-2]), int(img.shape[-1])
            buckets.setdefault((h, w), []).append(idx)

        results = [None] * len(image_batch)
        for (h, w), idxs in buckets.items():
            h_out, w_out = self._output_size(h, w)
            # masks are integer-valued uint8; nearest resize commutes with the byte cast
            stacks = [image_batch[i].astype(jnp.uint8) for i in idxs]
            counts = [int(s.shape[0]) for s in stacks]
            merged = stacks[0] if len(stacks) == 1 else jnp.concatenate(stacks, axis=0)
            out = pallas_nearest_resize(merged, h_out, w_out)
            off = 0
            for i, c in zip(idxs, counts):
                results[i] = out[off:off + c]
                off += c
        return results


# ----------------------------- reference check -----------------------------

def _ref_resize(image_np, h_out, w_out):
    """NumPy reference: nearest gather + byte cast (torch mode='nearest')."""
    rsrc = _nearest_src_indices_np(image_np.shape[1], h_out).astype(np.int64)
    csrc = _nearest_src_indices_np(image_np.shape[2], w_out).astype(np.int64)
    return image_np.astype(np.float32)[:, rsrc][:, :, csrc].astype(np.uint8)


if __name__ == "__main__":
    key = jax.random.PRNGKey(0)
    k1, k2, k3, k4, k5 = jax.random.split(key, 5)

    transform = RdMaskTransformPallas(min_size=8, max_size=12)

    # mask stacks of varying spatial sizes (exercise both scale-factor branches,
    # both gather orders, and a >32-mask bucket that runs the chunked grid + padding)
    sub_inputs = [
        jax.random.randint(k1, (3, 16, 20), 0, 256, dtype=jnp.int32).astype(jnp.uint8),
        jax.random.randint(k2, (3, 12, 16), 0, 256, dtype=jnp.int32).astype(jnp.uint8),
        jax.random.randint(k5, (35, 16, 20), 0, 256, dtype=jnp.int32).astype(jnp.uint8),
    ]
    obj_inputs = [
        jax.random.randint(k3, (2, 16, 16), 0, 256, dtype=jnp.int32).astype(jnp.uint8),
        jax.random.randint(k4, (2, 24, 10), 0, 256, dtype=jnp.int32).astype(jnp.uint8),
    ]

    person_list, obj_list = transform(sub_inputs, obj_inputs)
    for o in person_list + obj_list:
        jax.block_until_ready(o)

    # sanity check against the NumPy nearest-resize reference
    for img, out in zip(sub_inputs + obj_inputs, person_list + obj_list):
        assert out.dtype == jnp.uint8
        assert out.shape[0] == img.shape[0]
        _, ho, wo = out.shape
        ref = _ref_resize(np.asarray(img), ho, wo)
        np.testing.assert_array_equal(np.asarray(out), ref)

    print("KERNEL_OK")
</pallas_src>

<mosaic_0001>
module attributes {stable_mosaic.version = 11 : i64} {
  func.func @_resize_kernel(%arg0: i32, %arg1: memref<8x1xi32, #tpu.memory_space<vmem>>, %arg2: memref<1x10xi32, #tpu.memory_space<vmem>>, %arg3: memref<32x16x20xi8, #tpu.memory_space<vmem>>, %arg4: memref<32x8x10xi8, #tpu.memory_space<vmem>>, %arg5: memref<256x20xf32, #tpu.memory_space<vmem>>) attributes {dimension_semantics = [#tpu.dimension_semantics<parallel>], iteration_bounds = array<i64: 2>, scalar_prefetch = 0 : i64, scratch_operands = 1 : i64, tpu.core_type = #tpu.core_type<tc>, window_params = [{pipeline_mode = #tpu.pipeline_mode<synchronous>, transform_indices = @transform_0, window_bounds = array<i64: 8, 1>}, {pipeline_mode = #tpu.pipeline_mode<synchronous>, transform_indices = @transform_1, window_bounds = array<i64: 1, 10>}, {transform_indices = @transform_2, window_bounds = array<i64: 32, 16, 20>}, {transform_indices = @transform_3, window_bounds = array<i64: 32, 8, 10>}]} {
    %0 = tpu.iota {dimensions = array<i32: 1>} : vector<8x16xi32>
    %c0 = arith.constant 0 : index
    %c0_0 = arith.constant 0 : index
    %1 = vector.load %arg1[%c0, %c0_0] : memref<8x1xi32, #tpu.memory_space<vmem>>, vector<8x1xi32>
    %2 = vector.broadcast %1 : vector<8x1xi32> to vector<8x16xi32>
    %3 = arith.cmpi eq, %0, %2 : vector<8x16xi32>
    %cst = arith.constant 1.000000e+00 : f32
    %cst_1 = arith.constant 0.000000e+00 : f32
    %4 = vector.broadcast %cst : f32 to vector<8x16xf32>
    %5 = vector.broadcast %cst_1 : f32 to vector<8x16xf32>
    %6 = arith.select %3, %4, %5 : vector<8x16xi1>, vector<8x16xf32>
    %7 = arith.truncf %6 : vector<8x16xf32> to vector<8x16xbf16>
    %8 = tpu.iota {dimensions = array<i32: 0>} : vector<20x10xi32>
    %c0_2 = arith.constant 0 : index
    %c0_3 = arith.constant 0 : index
    %9 = vector.load %arg2[%c0_2, %c0_3] : memref<1x10xi32, #tpu.memory_space<vmem>>, vector<1x10xi32>
    %10 = vector.broadcast %9 : vector<1x10xi32> to vector<20x10xi32>
    %11 = arith.cmpi eq, %8, %10 : vector<20x10xi32>
    %cst_4 = arith.constant 1.000000e+00 : f32
    %cst_5 = arith.constant 0.000000e+00 : f32
    %12 = vector.broadcast %cst_4 : f32 to vector<20x10xf32>
    %13 = vector.broadcast %cst_5 : f32 to vector<20x10xf32>
    %14 = arith.select %11, %12, %13 : vector<20x10xi1>, vector<20x10xf32>
    %15 = arith.truncf %14 : vector<20x10xf32> to vector<20x10xbf16>
    %c0_6 = arith.constant 0 : index
    %c0_7 = arith.constant 0 : index
    %c0_8 = arith.constant 0 : index
    %16 = vector.load %arg3[%c0_6, %c0_7, %c0_8] : memref<32x16x20xi8, #tpu.memory_space<vmem>>, vector<32x16x20xi8>
    %17 = arith.uitofp %16 : vector<32x16x20xi8> to vector<32x16x20xf32>
    %18 = arith.truncf %17 : vector<32x16x20xf32> to vector<32x16x20xbf16>
    %19 = vector.extract_strided_slice %18 {offsets = [0, 0, 0], sizes = [1, 16, 20], strides = [1, 1, 1]} : vector<32x16x20xbf16> to vector<1x16x20xbf16>
    %20 = vector.shape_cast %19 : vector<1x16x20xbf16> to vector<16x20xbf16>
    %cst_9 = arith.constant dense<0.000000e+00> : vector<8x20xf32>
    %21 = tpu.matmul %7, %20, %cst_9 {dimension_numbers = #tpu.dot_dimension_numbers<[1], [0], [0], [1], [0, 0, 1, 1], [], []>} : vector<8x16xbf16>, vector<16x20xbf16>, vector<8x20xf32> -> vector<8x20xf32>
    %c0_10 = arith.constant 0 : index
    %c0_11 = arith.constant 0 : index
    %22 = vector.load %arg5[%c0_10, %c0_11] : memref<256x20xf32, #tpu.memory_space<vmem>>, vector<8x20xf32>
    tpu.vector_store %arg5[%c0_10, %c0_11], %21 {strides = array<i32>} : memref<256x20xf32, #tpu.memory_space<vmem>>, vector<8x20xf32>,
    %23 = vector.extract_strided_slice %18 {offsets = [1, 0, 0], sizes = [1, 16, 20], strides = [1, 1, 1]} : vector<32x16x20xbf16> to vector<1x16x20xbf16>
    %24 = vector.shape_cast %23 : vector<1x16x20xbf16> to vector<16x20xbf16>
    %cst_12 = arith.constant dense<0.000000e+00> : vector<8x20xf32>
    %25 = tpu.matmul %7, %24, %cst_12 {dimension_numbers = #tpu.dot_dimension_numbers<[1], [0], [0], [1], [0, 0, 1, 1], [], []>} : vector<8x16xbf16>, vector<16x20xbf16>, vector<8x20xf32> -> vector<8x20xf32>
    %c8 = arith.constant 8 : index
    %c0_13 = arith.constant 0 : index
    %26 = vector.load %arg5[%c8, %c0_13] : memref<256x20xf32, #tpu.memory_space<vmem>>, vector<8x20xf32>
    tpu.vector_store %arg5[%c8, %c0_13], %25 {strides = array<i32>} : memref<256x20xf32, #tpu.memory_space<vmem>>, vector<8x20xf32>,
    %27 = vector.extract_strided_slice %18 {offsets = [2, 0, 0], sizes = [1, 16, 20], strides = [1, 1, 1]} : vector<32x16x20xbf16> to vector<1x16x20xbf16>
    %28 = vector.shape_cast %27 : vector<1x16x20xbf16> to vector<16x20xbf16>
    %cst_14 = arith.constant dense<0.000000e+00> : vector<8x20xf32>
    %29 = tpu.matmul %7, %28, %cst_14 {dimension_numbers = #tpu.dot_dimension_numbers<[1], [0], [0], [1], [0, 0, 1, 1], [], []>} : vector<8x16xbf16>, vector<16x20xbf16>, vector<8x20xf32> -> vector<8x20xf32>
    %c16 = arith.constant 16 : index
    %c0_15 = arith.constant 0 : index
    %30 = vector.load %arg5[%c16, %c0_15] : memref<256x20xf32, #tpu.memory_space<vmem>>, vector<8x20xf32>
    tpu.vector_store %arg5[%c16, %c0_15], %29 {strides = array<i32>} : memref<256x20xf32, #tpu.memory_space<vmem>>, vector<8x20xf32>,
    %31 = vector.extract_strided_slice %18 {offsets = [3, 0, 0], sizes = [1, 16, 20], strides = [1, 1, 1]} : vector<32x16x20xbf16> to vector<1x16x20xbf16>
    %32 = vector.shape_cast %31 : vector<1x16x20xbf16> to vector<16x20xbf16>
    %cst_16 = arith.constant dense<0.000000e+00> : vector<8x20xf32>
    %33 = tpu.matmul %7, %32, %cst_16 {dimension_numbers = #tpu.dot_dimension_numbers<[1], [0], [0], [1], [0, 0, 1, 1], [], []>} : vector<8x16xbf16>, vector<16x20xbf16>, vector<8x20xf32> -> vector<8x20xf32>
    %c24 = arith.constant 24 : index
    %c0_17 = arith.constant 0 : index
    %34 = vector.load %arg5[%c24, %c0_17] : memref<256x20xf32, #tpu.memory_space<vmem>>, vector<8x20xf32>
    tpu.vector_store %arg5[%c24, %c0_17], %33 {strides = array<i32>} : memref<256x20xf32, #tpu.memory_space<vmem>>, vector<8x20xf32>,
    %35 = vector.extract_strided_slice %18 {offsets = [4, 0, 0], sizes = [1, 16, 20], strides = [1, 1, 1]} : vector<32x16x20xbf16> to vector<1x16x20xbf16>
    %36 = vector.shape_cast %35 : vector<1x16x20xbf16> to vector<16x20xbf16>
    %cst_18 = arith.constant dense<0.000000e+00> : vector<8x20xf32>
    %37 = tpu.matmul %7, %36, %cst_18 {dimension_numbers = #tpu.dot_dimension_numbers<[1], [0], [0], [1], [0, 0, 1, 1], [], []>} : vector<8x16xbf16>, vector<16x20xbf16>, vector<8x20xf32> -> vector<8x20xf32>
    %c32 = arith.constant 32 : index
    %c0_19 = arith.constant 0 : index
    %38 = vector.load %arg5[%c32, %c0_19] : memref<256x20xf32, #tpu.memory_space<vmem>>, vector<8x20xf32>
    tpu.vector_store %arg5[%c32, %c0_19], %37 {strides = array<i32>} : memref<256x20xf32, #tpu.memory_space<vmem>>, vector<8x20xf32>,
    %39 = vector.extract_strided_slice %18 {offsets = [5, 0, 0], sizes = [1, 16, 20], strides = [1, 1, 1]} : vector<32x16x20xbf16> to vector<1x16x20xbf16>
    %40 = vector.shape_cast %39 : vector<1x16x20xbf16> to vector<16x20xbf16>
    %cst_20 = arith.constant dense<0.000000e+00> : vector<8x20xf32>
    %41 = tpu.matmul %7, %40, %cst_20 {dimension_numbers = #tpu.dot_dimension_numbers<[1], [0], [0], [1], [0, 0, 1, 1], [], []>} : vector<8x16xbf16>, vector<16x20xbf16>, vector<8x20xf32> -> vector<8x20xf32>
    %c40 = arith.constant 40 : index
    %c0_21 = arith.constant 0 : index
    %42 = vector.load %arg5[%c40, %c0_21] : memref<256x20xf32, #tpu.memory_space<vmem>>, vector<8x20xf32>
    tpu.vector_store %arg5[%c40, %c0_21], %41 {strides = array<i32>} : memref<256x20xf32, #tpu.memory_space<vmem>>, vector<8x20xf32>,
    %43 = vector.extract_strided_slice %18 {offsets = [6, 0, 0], sizes = [1, 16, 20], strides = [1, 1, 1]} : vector<32x16x20xbf16> to vector<1x16x20xbf16>
    %44 = vector.shape_cast %43 : vector<1x16x20xbf16> to vector<16x20xbf16>
    %cst_22 = arith.constant dense<0.000000e+00> : vector<8x20xf32>
    %45 = tpu.matmul %7, %44, %cst_22 {dimension_numbers = #tpu.dot_dimension_numbers<[1], [0], [0], [1], [0, 0, 1, 1], [], []>} : vector<8x16xbf16>, vector<16x20xbf16>, vector<8x20xf32> -> vector<8x20xf32>
    %c48 = arith.constant 48 : index
    %c0_23 = arith.constant 0 : index
    %46 = vector.load %arg5[%c48, %c0_23] : memref<256x20xf32, #tpu.memory_space<vmem>>, vector<8x20xf32>
    tpu.vector_store %arg5[%c48, %c0_23], %45 {strides = array<i32>} : memref<256x20xf32, #tpu.memory_space<vmem>>, vector<8x20xf32>,
    %47 = vector.extract_strided_slice %18 {offsets = [7, 0, 0], sizes = [1, 16, 20], strides = [1, 1, 1]} : vector<32x16x20xbf16> to vector<1x16x20xbf16>
    %48 = vector.shape_cast %47 : vector<1x16x20xbf16> to vector<16x20xbf16>
    %cst_24 = arith.constant dense<0.000000e+00> : vector<8x20xf32>
    %49 = tpu.matmul %7, %48, %cst_24 {dimension_numbers = #tpu.dot_dimension_numbers<[1], [0], [0], [1], [0, 0, 1, 1], [], []>} : vector<8x16xbf16>, vector<16x20xbf16>, vector<8x20xf32> -> vector<8x20xf32>
    %c56 = arith.constant 56 : index
    %c0_25 = arith.constant 0 : index
    %50 = vector.load %arg5[%c56, %c0_25] : memref<256x20xf32, #tpu.memory_space<vmem>>, vector<8x20xf32>
    tpu.vector_store %arg5[%c56, %c0_25], %49 {strides = array<i32>} : memref<256x20xf32, #tpu.memory_space<vmem>>, vector<8x20xf32>,
    %51 = vector.extract_strided_slice %18 {offsets = [8, 0, 0], sizes = [1, 16, 20], strides = [1, 1, 1]} : vector<32x16x20xbf16> to vector<1x16x20xbf16>
    %52 = vector.shape_cast %51 : vector<1x16x20xbf16> to vector<16x20xbf16>
    %cst_26 = arith.constant dense<0.000000e+00> : vector<8x20xf32>
    %53 = tpu.matmul %7, %52, %cst_26 {dimension_numbers = #tpu.dot_dimension_numbers<[1], [0], [0], [1], [0, 0, 1, 1], [], []>} : vector<8x16xbf16>, vector<16x20xbf16>, vector<8x20xf32> -> vector<8x20xf32>
    %c64 = arith.constant 64 : index
    %c0_27 = arith.constant 0 : index
    %54 = vector.load %arg5[%c64, %c0_27] : memref<256x20xf32, #tpu.memory_space<vmem>>, vector<8x20xf32>
    tpu.vector_store %arg5[%c64, %c0_27], %53 {strides = array<i32>} : memref<256x20xf32, #tpu.memory_space<vmem>>, vector<8x20xf32>,
    %55 = vector.extract_strided_slice %18 {offsets = [9, 0, 0], sizes = [1, 16, 20], strides = [1, 1, 1]} : vector<32x16x20xbf16> to vector<1x16x20xbf16>
    %56 = vector.shape_cast %55 : vector<1x16x20xbf16> to vector<16x20xbf16>
    %cst_28 = arith.constant dense<0.000000e+00> : vector<8x20xf32>
    %57 = tpu.matmul %7, %56, %cst_28 {dimension_numbers = #tpu.dot_dimension_numbers<[1], [0], [0], [1], [0, 0, 1, 1], [], []>} : vector<8x16xbf16>, vector<16x20xbf16>, vector<8x20xf32> -> vector<8x20xf32>
    %c72 = arith.constant 72 : index
    %c0_29 = arith.constant 0 : index
    %58 = vector.load %arg5[%c72, %c0_29] : memref<256x20xf32, #tpu.memory_space<vmem>>, vector<8x20xf32>
    tpu.vector_store %arg5[%c72, %c0_29], %57 {strides = array<i32>} : memref<256x20xf32, #tpu.memory_space<vmem>>, vector<8x20xf32>,
    %59 = vector.extract_strided_slice %18 {offsets = [10, 0, 0], sizes = [1, 16, 20], strides = [1, 1, 1]} : vector<32x16x20xbf16> to vector<1x16x20xbf16>
    %60 = vector.shape_cast %59 : vector<1x16x20xbf16> to vector<16x20xbf16>
    %cst_30 = arith.constant dense<0.000000e+00> : vector<8x20xf32>
    %61 = tpu.matmul %7, %60, %cst_30 {dimension_numbers = #tpu.dot_dimension_numbers<[1], [0], [0], [1], [0, 0, 1, 1], [], []>} : vector<8x16xbf16>, vector<16x20xbf16>, vector<8x20xf32> -> vector<8x20xf32>
    %c80 = arith.constant 80 : index
    %c0_31 = arith.constant 0 : index
    %62 = vector.load %arg5[%c80, %c0_31] : memref<256x20xf32, #tpu.memory_space<vmem>>, vector<8x20xf32>
    tpu.vector_store %arg5[%c80, %c0_31], %61 {strides = array<i32>} : memref<256x20xf32, #tpu.memory_space<vmem>>, vector<8x20xf32>,
    %63 = vector.extract_strided_slice %18 {offsets = [11, 0, 0], sizes = [1, 16, 20], strides = [1, 1, 1]} : vector<32x16x20xbf16> to vector<1x16x20xbf16>
    %64 = vector.shape_cast %63 : vector<1x16x20xbf16> to vector<16x20xbf16>
    %cst_32 = arith.constant dense<0.000000e+00> : vector<8x20xf32>
    %65 = tpu.matmul %7, %64, %cst_32 {dimension_numbers = #tpu.dot_dimension_numbers<[1], [0], [0], [1], [0, 0, 1, 1], [], []>} : vector<8x16xbf16>, vector<16x20xbf16>, vector<8x20xf32> -> vector<8x20xf32>
    %c88 = arith.constant 88 : index
    %c0_33 = arith.constant 0 : index
    %66 = vector.load %arg5[%c88, %c0_33] : memref<256x20xf32, #tpu.memory_space<vmem>>, vector<8x20xf32>
    tpu.vector_store %arg5[%c88, %c0_33], %65 {strides = array<i32>} : memref<256x20xf32, #tpu.memory_space<vmem>>, vector<8x20xf32>,
    %67 = vector.extract_strided_slice %18 {offsets = [12, 0, 0], sizes = [1, 16, 20], strides = [1, 1, 1]} : vector<32x16x20xbf16> to vector<1x16x20xbf16>
    %68 = vector.shape_cast %67 : vector<1x16x20xbf16> to vector<16x20xbf16>
    %cst_34 = arith.constant dense<0.000000e+00> : vector<8x20xf32>
    %69 = tpu.matmul %7, %68, %cst_34 {dimension_numbers = #tpu.dot_dimension_numbers<[1], [0], [0], [1], [0, 0, 1, 1], [], []>} : vector<8x16xbf16>, vector<16x20xbf16>, vector<8x20xf32> -> vector<8x20xf32>
    %c96 = arith.constant 96 : index
    %c0_35 = arith.constant 0 : index
    %70 = vector.load %arg5[%c96, %c0_35] : memref<256x20xf32, #tpu.memory_space<vmem>>, vector<8x20xf32>
    tpu.vector_store %arg5[%c96, %c0_35], %69 {strides = array<i32>} : memref<256x20xf32, #tpu.memory_space<vmem>>, vector<8x20xf32>,
    %71 = vector.extract_strided_slice %18 {offsets = [13, 0, 0], sizes = [1, 16, 20], strides = [1, 1, 1]} : vector<32x16x20xbf16> to vector<1x16x20xbf16>
    %72 = vector.shape_cast %71 : vector<1x16x20xbf16> to vector<16x20xbf16>
    %cst_36 = arith.constant dense<0.000000e+00> : vector<8x20xf32>
    %73 = tpu.matmul %7, %72, %cst_36 {dimension_numbers = #tpu.dot_dimension_numbers<[1], [0], [0], [1], [0, 0, 1, 1], [], []>} : vector<8x16xbf16>, vector<16x20xbf16>, vector<8x20xf32> -> vector<8x20xf32>
    %c104 = arith.constant 104 : index
    %c0_37 = arith.constant 0 : index
    %74 = vector.load %arg5[%c104, %c0_37] : memref<256x20xf32, #tpu.memory_space<vmem>>, vector<8x20xf32>
    tpu.vector_store %arg5[%c104, %c0_37], %73 {strides = array<i32>} : memref<256x20xf32, #tpu.memory_space<vmem>>, vector<8x20xf32>,
    %75 = vector.extract_strided_slice %18 {offsets = [14, 0, 0], sizes = [1, 16, 20], strides = [1, 1, 1]} : vector<32x16x20xbf16> to vector<1x16x20xbf16>
    %76 = vector.shape_cast %75 : vector<1x16x20xbf16> to vector<16x20xbf16>
    %cst_38 = arith.constant dense<0.000000e+00> : vector<8x20xf32>
    %77 = tpu.matmul %7, %76, %cst_38 {dimension_numbers = #tpu.dot_dimension_numbers<[1], [0], [0], [1], [0, 0, 1, 1], [], []>} : vector<8x16xbf16>, vector<16x20xbf16>, vector<8x20xf32> -> vector<8x20xf32>
    %c112 = arith.constant 112 : index
    %c0_39 = arith.constant 0 : index
    %78 = vector.load %arg5[%c112, %c0_39] : memref<256x20xf32, #tpu.memory_space<vmem>>, vector<8x20xf32>
    tpu.vector_store %arg5[%c112, %c0_39], %77 {strides = array<i32>} : memref<256x20xf32, #tpu.memory_space<vmem>>, vector<8x20xf32>,
    %79 = vector.extract_strided_slice %18 {offsets = [15, 0, 0], sizes = [1, 16, 20], strides = [1, 1, 1]} : vector<32x16x20xbf16> to vector<1x16x20xbf16>
    %80 = vector.shape_cast %79 : vector<1x16x20xbf16> to vector<16x20xbf16>
    %cst_40 = arith.constant dense<0.000000e+00> : vector<8x20xf32>
    %81 = tpu.matmul %7, %80, %cst_40 {dimension_numbers = #tpu.dot_dimension_numbers<[1], [0], [0], [1], [0, 0, 1, 1], [], []>} : vector<8x16xbf16>, vector<16x20xbf16>, vector<8x20xf32> -> vector<8x20xf32>
    %c120 = arith.constant 120 : index
    %c0_41 = arith.constant 0 : index
    %82 = vector.load %arg5[%c120, %c0_41] : memref<256x20xf32, #tpu.memory_space<vmem>>, vector<8x20xf32>
    tpu.vector_store %arg5[%c120, %c0_41], %81 {strides = array<i32>} : memref<256x20xf32, #tpu.memory_space<vmem>>, vector<8x20xf32>,
    %83 = vector.extract_strided_slice %18 {offsets = [16, 0, 0], sizes = [1, 16, 20], strides = [1, 1, 1]} : vector<32x16x20xbf16> to vector<1x16x20xbf16>
    %84 = vector.shape_cast %83 : vector<1x16x20xbf16> to vector<16x20xbf16>
    %cst_42 = arith.constant dense<0.000000e+00> : vector<8x20xf32>
    %85 = tpu.matmul %7, %84, %cst_42 {dimension_numbers = #tpu.dot_dimension_numbers<[1], [0], [0], [1], [0, 0, 1, 1], [], []>} : vector<8x16xbf16>, vector<16x20xbf16>, vector<8x20xf32> -> vector<8x20xf32>
    %c128 = arith.constant 128 : index
    %c0_43 = arith.constant 0 : index
    %86 = vector.load %arg5[%c128, %c0_43] : memref<256x20xf32, #tpu.memory_space<vmem>>, vector<8x20xf32>
    tpu.vector_store %arg5[%c128, %c0_43], %85 {strides = array<i32>} : memref<256x20xf32, #tpu.memory_space<vmem>>, vector<8x20xf32>,
    %87 = vector.extract_strided_slice %18 {offsets = [17, 0, 0], sizes = [1, 16, 20], strides = [1, 1, 1]} : vector<32x16x20xbf16> to vector<1x16x20xbf16>
    %88 = vector.shape_cast %87 : vector<1x16x20xbf16> to vector<16x20xbf16>
    %cst_44 = arith.constant dense<0.000000e+00> : vector<8x20xf32>
    %89 = tpu.matmul %7, %88, %cst_44 {dimension_numbers = #tpu.dot_dimension_numbers<[1], [0], [0], [1], [0, 0, 1, 1], [], []>} : vector<8x16xbf16>, vector<16x20xbf16>, vector<8x20xf32> -> vector<8x20xf32>
    %c136 = arith.constant 136 : index
    %c0_45 = arith.constant 0 : index
    %90 = vector.load %arg5[%c136, %c0_45] : memref<256x20xf32, #tpu.memory_space<vmem>>, vector<8x20xf32>
    tpu.vector_store %arg5[%c136, %c0_45], %89 {strides = array<i32>} : memref<256x20xf32, #tpu.memory_space<vmem>>, vector<8x20xf32>,
    %91 = vector.extract_strided_slice %18 {offsets = [18, 0, 0], sizes = [1, 16, 20], strides = [1, 1, 1]} : vector<32x16x20xbf16> to vector<1x16x20xbf16>
    %92 = vector.shape_cast %91 : vector<1x16x20xbf16> to vector<16x20xbf16>
    %cst_46 = arith.constant dense<0.000000e+00> : vector<8x20xf32>
    %93 = tpu.matmul %7, %92, %cst_46 {dimension_numbers = #tpu.dot_dimension_numbers<[1], [0], [0], [1], [0, 0, 1, 1], [], []>} : vector<8x16xbf16>, vector<16x20xbf16>, vector<8x20xf32> -> vector<8x20xf32>
    %c144 = arith.constant 144 : index
    %c0_47 = arith.constant 0 : index
    %94 = vector.load %arg5[%c144, %c0_47] : memref<256x20xf32, #tpu.memory_space<vmem>>, vector<8x20xf32>
    tpu.vector_store %arg5[%c144, %c0_47], %93 {strides = array<i32>} : memref<256x20xf32, #tpu.memory_space<vmem>>, vector<8x20xf32>,
    %95 = vector.extract_strided_slice %18 {offsets = [19, 0, 0], sizes = [1, 16, 20], strides = [1, 1, 1]} : vector<32x16x20xbf16> to vector<1x16x20xbf16>
    %96 = vector.shape_cast %95 : vector<1x16x20xbf16> to vector<16x20xbf16>
    %cst_48 = arith.constant dense<0.000000e+00> : vector<8x20xf32>
    %97 = tpu.matmul %7, %96, %cst_48 {dimension_numbers = #tpu.dot_dimension_numbers<[1], [0], [0], [1], [0, 0, 1, 1], [], []>} : vector<8x16xbf16>, vector<16x20xbf16>, vector<8x20xf32> -> vector<8x20xf32>
    %c152 = arith.constant 152 : index
    %c0_49 = arith.constant 0 : index
    %98 = vector.load %arg5[%c152, %c0_49] : memref<256x20xf32, #tpu.memory_space<vmem>>, vector<8x20xf32>
    tpu.vector_store %arg5[%c152, %c0_49], %97 {strides = array<i32>} : memref<256x20xf32, #tpu.memory_space<vmem>>, vector<8x20xf32>,
    %99 = vector.extract_strided_slice %18 {offsets = [20, 0, 0], sizes = [1, 16, 20], strides = [1, 1, 1]} : vector<32x16x20xbf16> to vector<1x16x20xbf16>
    %100 = vector.shape_cast %99 : vector<1x16x20xbf16> to vector<16x20xbf16>
    %cst_50 = arith.constant dense<0.000000e+00> : vector<8x20xf32>
    %101 = tpu.matmul %7, %100, %cst_50 {dimension_numbers = #tpu.dot_dimension_numbers<[1], [0], [0], [1], [0, 0, 1, 1], [], []>} : vector<8x16xbf16>, vector<16x20xbf16>, vector<8x20xf32> -> vector<8x20xf32>
    %c160 = arith.constant 160 : index
    %c0_51 = arith.constant 0 : index
    %102 = vector.load %arg5[%c160, %c0_51] : memref<256x20xf32, #tpu.memory_space<vmem>>, vector<8x20xf32>
    tpu.vector_store %arg5[%c160, %c0_51], %101 {strides = array<i32>} : memref<256x20xf32, #tpu.memory_space<vmem>>, vector<8x20xf32>,
    %103 = vector.extract_strided_slice %18 {offsets = [21, 0, 0], sizes = [1, 16, 20], strides = [1, 1, 1]} : vector<32x16x20xbf16> to vector<1x16x20xbf16>
    %104 = vector.shape_cast %103 : vector<1x16x20xbf16> to vector<16x20xbf16>
    %cst_52 = arith.constant dense<0.000000e+00> : vector<8x20xf32>
    %105 = tpu.matmul %7, %104, %cst_52 {dimension_numbers = #tpu.dot_dimension_numbers<[1], [0], [0], [1], [0, 0, 1, 1], [], []>} : vector<8x16xbf16>, vector<16x20xbf16>, vector<8x20xf32> -> vector<8x20xf32>
    %c168 = arith.constant 168 : index
    %c0_53 = arith.constant 0 : index
    %106 = vector.load %arg5[%c168, %c0_53] : memref<256x20xf32, #tpu.memory_space<vmem>>, vector<8x20xf32>
    tpu.vector_store %arg5[%c168, %c0_53], %105 {strides = array<i32>} : memref<256x20xf32, #tpu.memory_space<vmem>>, vector<8x20xf32>,
    %107 = vector.extract_strided_slice %18 {offsets = [22, 0, 0], sizes = [1, 16, 20], strides = [1, 1, 1]} : vector<32x16x20xbf16> to vector<1x16x20xbf16>
    %108 = vector.shape_cast %107 : vector<1x16x20xbf16> to vector<16x20xbf16>
    %cst_54 = arith.constant dense<0.000000e+00> : vector<8x20xf32>
    %109 = tpu.matmul %7, %108, %cst_54 {dimension_numbers = #tpu.dot_dimension_numbers<[1], [0], [0], [1], [0, 0, 1, 1], [], []>} : vector<8x16xbf16>, vector<16x20xbf16>, vector<8x20xf32> -> vector<8x20xf32>
    %c176 = arith.constant 176 : index
    %c0_55 = arith.constant 0 : index
    %110 = vector.load %arg5[%c176, %c0_55] : memref<256x20xf32, #tpu.memory_space<vmem>>, vector<8x20xf32>
    tpu.vector_store %arg5[%c176, %c0_55], %109 {strides = array<i32>} : memref<256x20xf32, #tpu.memory_space<vmem>>, vector<8x20xf32>,
    %111 = vector.extract_strided_slice %18 {offsets = [23, 0, 0], sizes = [1, 16, 20], strides = [1, 1, 1]} : vector<32x16x20xbf16> to vector<1x16x20xbf16>
    %112 = vector.shape_cast %111 : vector<1x16x20xbf16> to vector<16x20xbf16>
    %cst_56 = arith.constant dense<0.000000e+00> : vector<8x20xf32>
    %113 = tpu.matmul %7, %112, %cst_56 {dimension_numbers = #tpu.dot_dimension_numbers<[1], [0], [0], [1], [0, 0, 1, 1], [], []>} : vector<8x16xbf16>, vector<16x20xbf16>, vector<8x20xf32> -> vector<8x20xf32>
    %c184 = arith.constant 184 : index
    %c0_57 = arith.constant 0 : index
    %114 = vector.load %arg5[%c184, %c0_57] : memref<256x20xf32, #tpu.memory_space<vmem>>, vector<8x20xf32>
    tpu.vector_store %arg5[%c184, %c0_57], %113 {strides = array<i32>} : memref<256x20xf32, #tpu.memory_space<vmem>>, vector<8x20xf32>,
    %115 = vector.extract_strided_slice %18 {offsets = [24, 0, 0], sizes = [1, 16, 20], strides = [1, 1, 1]} : vector<32x16x20xbf16> to vector<1x16x20xbf16>
    %116 = vector.shape_cast %115 : vector<1x16x20xbf16> to vector<16x20xbf16>
    %cst_58 = arith.constant dense<0.000000e+00> : vector<8x20xf32>
    %117 = tpu.matmul %7, %116, %cst_58 {dimension_numbers = #tpu.dot_dimension_numbers<[1], [0], [0], [1], [0, 0, 1, 1], [], []>} : vector<8x16xbf16>, vector<16x20xbf16>, vector<8x20xf32> -> vector<8x20xf32>
    %c192 = arith.constant 192 : index
    %c0_59 = arith.constant 0 : index
    %118 = vector.load %arg5[%c192, %c0_59] : memref<256x20xf32, #tpu.memory_space<vmem>>, vector<8x20xf32>
    tpu.vector_store %arg5[%c192, %c0_59], %117 {strides = array<i32>} : memref<256x20xf32, #tpu.memory_space<vmem>>, vector<8x20xf32>,
    %119 = vector.extract_strided_slice %18 {offsets = [25, 0, 0], sizes = [1, 16, 20], strides = [1, 1, 1]} : vector<32x16x20xbf16> to vector<1x16x20xbf16>
    %120 = vector.shape_cast %119 : vector<1x16x20xbf16> to vector<16x20xbf16>
    %cst_60 = arith.constant dense<0.000000e+00> : vector<8x20xf32>
    %121 = tpu.matmul %7, %120, %cst_60 {dimension_numbers = #tpu.dot_dimension_numbers<[1], [0], [0], [1], [0, 0, 1, 1], [], []>} : vector<8x16xbf16>, vector<16x20xbf16>, vector<8x20xf32> -> vector<8x20xf32>
    %c200 = arith.constant 200 : index
    %c0_61 = arith.constant 0 : index
    %122 = vector.load %arg5[%c200, %c0_61] : memref<256x20xf32, #tpu.memory_space<vmem>>, vector<8x20xf32>
    tpu.vector_store %arg5[%c200, %c0_61], %121 {strides = array<i32>} : memref<256x20xf32, #tpu.memory_space<vmem>>, vector<8x20xf32>,
    %123 = vector.extract_strided_slice %18 {offsets = [26, 0, 0], sizes = [1, 16, 20], strides = [1, 1, 1]} : vector<32x16x20xbf16> to vector<1x16x20xbf16>
    %124 = vector.shape_cast %123 : vector<1x16x20xbf16> to vector<16x20xbf16>
    %cst_62 = arith.constant dense<0.000000e+00> : vector<8x20xf32>
    %125 = tpu.matmul %7, %124, %cst_62 {dimension_numbers = #tpu.dot_dimension_numbers<[1], [0], [0], [1], [0, 0, 1, 1], [], []>} : vector<8x16xbf16>, vector<16x20xbf16>, vector<8x20xf32> -> vector<8x20xf32>
    %c208 = arith.constant 208 : index
    %c0_63 = arith.constant 0 : index
    %126 = vector.load %arg5[%c208, %c0_63] : memref<256x20xf32, #tpu.memory_space<vmem>>, vector<8x20xf32>
    tpu.vector_store %arg5[%c208, %c0_63], %125 {strides = array<i32>} : memref<256x20xf32, #tpu.memory_space<vmem>>, vector<8x20xf32>,
    %127 = vector.extract_strided_slice %18 {offsets = [27, 0, 0], sizes = [1, 16, 20], strides = [1, 1, 1]} : vector<32x16x20xbf16> to vector<1x16x20xbf16>
    %128 = vector.shape_cast %127 : vector<1x16x20xbf16> to vector<16x20xbf16>
    %cst_64 = arith.constant dense<0.000000e+00> : vector<8x20xf32>
    %129 = tpu.matmul %7, %128, %cst_64 {dimension_numbers = #tpu.dot_dimension_numbers<[1], [0], [0], [1], [0, 0, 1, 1], [], []>} : vector<8x16xbf16>, vector<16x20xbf16>, vector<8x20xf32> -> vector<8x20xf32>
    %c216 = arith.constant 216 : index
    %c0_65 = arith.constant 0 : index
    %130 = vector.load %arg5[%c216, %c0_65] : memref<256x20xf32, #tpu.memory_space<vmem>>, vector<8x20xf32>
    tpu.vector_store %arg5[%c216, %c0_65], %129 {strides = array<i32>} : memref<256x20xf32, #tpu.memory_space<vmem>>, vector<8x20xf32>,
    %131 = vector.extract_strided_slice %18 {offsets = [28, 0, 0], sizes = [1, 16, 20], strides = [1, 1, 1]} : vector<32x16x20xbf16> to vector<1x16x20xbf16>
    %132 = vector.shape_cast %131 : vector<1x16x20xbf16> to vector<16x20xbf16>
    %cst_66 = arith.constant dense<0.000000e+00> : vector<8x20xf32>
    %133 = tpu.matmul %7, %132, %cst_66 {dimension_numbers = #tpu.dot_dimension_numbers<[1], [0], [0], [1], [0, 0, 1, 1], [], []>} : vector<8x16xbf16>, vector<16x20xbf16>, vector<8x20xf32> -> vector<8x20xf32>
    %c224 = arith.constant 224 : index
    %c0_67 = arith.constant 0 : index
    %134 = vector.load %arg5[%c224, %c0_67] : memref<256x20xf32, #tpu.memory_space<vmem>>, vector<8x20xf32>
    tpu.vector_store %arg5[%c224, %c0_67], %133 {strides = array<i32>} : memref<256x20xf32, #tpu.memory_space<vmem>>, vector<8x20xf32>,
    %135 = vector.extract_strided_slice %18 {offsets = [29, 0, 0], sizes = [1, 16, 20], strides = [1, 1, 1]} : vector<32x16x20xbf16> to vector<1x16x20xbf16>
    %136 = vector.shape_cast %135 : vector<1x16x20xbf16> to vector<16x20xbf16>
    %cst_68 = arith.constant dense<0.000000e+00> : vector<8x20xf32>
    %137 = tpu.matmul %7, %136, %cst_68 {dimension_numbers = #tpu.dot_dimension_numbers<[1], [0], [0], [1], [0, 0, 1, 1], [], []>} : vector<8x16xbf16>, vector<16x20xbf16>, vector<8x20xf32> -> vector<8x20xf32>
    %c232 = arith.constant 232 : index
    %c0_69 = arith.constant 0 : index
    %138 = vector.load %arg5[%c232, %c0_69] : memref<256x20xf32, #tpu.memory_space<vmem>>, vector<8x20xf32>
    tpu.vector_store %arg5[%c232, %c0_69], %137 {strides = array<i32>} : memref<256x20xf32, #tpu.memory_space<vmem>>, vector<8x20xf32>,
    %139 = vector.extract_strided_slice %18 {offsets = [30, 0, 0], sizes = [1, 16, 20], strides = [1, 1, 1]} : vector<32x16x20xbf16> to vector<1x16x20xbf16>
    %140 = vector.shape_cast %139 : vector<1x16x20xbf16> to vector<16x20xbf16>
    %cst_70 = arith.constant dense<0.000000e+00> : vector<8x20xf32>
    %141 = tpu.matmul %7, %140, %cst_70 {dimension_numbers = #tpu.dot_dimension_numbers<[1], [0], [0], [1], [0, 0, 1, 1], [], []>} : vector<8x16xbf16>, vector<16x20xbf16>, vector<8x20xf32> -> vector<8x20xf32>
    %c240 = arith.constant 240 : index
    %c0_71 = arith.constant 0 : index
    %142 = vector.load %arg5[%c240, %c0_71] : memref<256x20xf32, #tpu.memory_space<vmem>>, vector<8x20xf32>
    tpu.vector_store %arg5[%c240, %c0_71], %141 {strides = array<i32>} : memref<256x20xf32, #tpu.memory_space<vmem>>, vector<8x20xf32>,
    %143 = vector.extract_strided_slice %18 {offsets = [31, 0, 0], sizes = [1, 16, 20], strides = [1, 1, 1]} : vector<32x16x20xbf16> to vector<1x16x20xbf16>
    %144 = vector.shape_cast %143 : vector<1x16x20xbf16> to vector<16x20xbf16>
    %cst_72 = arith.constant dense<0.000000e+00> : vector<8x20xf32>
    %145 = tpu.matmul %7, %144, %cst_72 {dimension_numbers = #tpu.dot_dimension_numbers<[1], [0], [0], [1], [0, 0, 1, 1], [], []>} : vector<8x16xbf16>, vector<16x20xbf16>, vector<8x20xf32> -> vector<8x20xf32>
    %c248 = arith.constant 248 : index
    %c0_73 = arith.constant 0 : index
    %146 = vector.load %arg5[%c248, %c0_73] : memref<256x20xf32, #tpu.memory_space<vmem>>, vector<8x20xf32>
    tpu.vector_store %arg5[%c248, %c0_73], %145 {strides = array<i32>} : memref<256x20xf32, #tpu.memory_space<vmem>>, vector<8x20xf32>,
    %c0_74 = arith.constant 0 : index
    %c0_75 = arith.constant 0 : index
    %147 = vector.load %arg5[%c0_74, %c0_75] : memref<256x20xf32, #tpu.memory_space<vmem>>, vector<256x20xf32>
    %148 = arith.truncf %147 : vector<256x20xf32> to vector<256x20xbf16>
    %cst_76 = arith.constant dense<0.000000e+00> : vector<256x10xf32>
    %149 = tpu.matmul %148, %15, %cst_76 {dimension_numbers = #tpu.dot_dimension_numbers<[1], [0], [0], [1], [0, 0, 1, 1], [], []>} : vector<256x20xbf16>, vector<20x10xbf16>, vector<256x10xf32> -> vector<256x10xf32>
    %150 = vector.extract_strided_slice %149 {offsets = [0, 0], sizes = [8, 10], strides = [1, 1]} : vector<256x10xf32> to vector<8x10xf32>
    %151 = arith.fptoui %150 : vector<8x10xf32> to vector<8x10xi8>
    %c0_77 = arith.constant 0 : index
    %c0_78 = arith.constant 0 : index
    %c0_79 = arith.constant 0 : index
    %152 = vector.load %arg4[%c0_77, %c0_78, %c0_79] : memref<32x8x10xi8, #tpu.memory_space<vmem>>, vector<1x8x10xi8>
    %153 = vector.shape_cast %152 : vector<1x8x10xi8> to vector<8x10xi8>
    %154 = vector.shape_cast %151 : vector<8x10xi8> to vector<1x8x10xi8>
    tpu.vector_store %arg4[%c0_77, %c0_78, %c0_79], %154 {strides = array<i32>} : memref<32x8x10xi8, #tpu.memory_space<vmem>>, vector<1x8x10xi8>,
    %155 = vector.extract_strided_slice %149 {offsets = [8, 0], sizes = [8, 10], strides = [1, 1]} : vector<256x10xf32> to vector<8x10xf32>
    %156 = arith.fptoui %155 : vector<8x10xf32> to vector<8x10xi8>
    %c1 = arith.constant 1 : index
    %c0_80 = arith.constant 0 : index
    %c0_81 = arith.constant 0 : index
    %157 = vector.load %arg4[%c1, %c0_80, %c0_81] : memref<32x8x10xi8, #tpu.memory_space<vmem>>, vector<1x8x10xi8>
    %158 = vector.shape_cast %157 : vector<1x8x10xi8> to vector<8x10xi8>
    %159 = vector.shape_cast %156 : vector<8x10xi8> to vector<1x8x10xi8>
    tpu.vector_store %arg4[%c1, %c0_80, %c0_81], %159 {strides = array<i32>} : memref<32x8x10xi8, #tpu.memory_space<vmem>>, vector<1x8x10xi8>,
    %160 = vector.extract_strided_slice %149 {offsets = [16, 0], sizes = [8, 10], strides = [1, 1]} : vector<256x10xf32> to vector<8x10xf32>
    %161 = arith.fptoui %160 : vector<8x10xf32> to vector<8x10xi8>
    %c2 = arith.constant 2 : index
    %c0_82 = arith.constant 0 : index
    %c0_83 = arith.constant 0 : index
    %162 = vector.load %arg4[%c2, %c0_82, %c0_83] : memref<32x8x10xi8, #tpu.memory_space<vmem>>, vector<1x8x10xi8>
    %163 = vector.shape_cast %162 : vector<1x8x10xi8> to vector<8x10xi8>
    %164 = vector.shape_cast %161 : vector<8x10xi8> to vector<1x8x10xi8>
    tpu.vector_store %arg4[%c2, %c0_82, %c0_83], %164 {strides = array<i32>} : memref<32x8x10xi8, #tpu.memory_space<vmem>>, vector<1x8x10xi8>,
    %165 = vector.extract_strided_slice %149 {offsets = [24, 0], sizes = [8, 10], strides = [1, 1]} : vector<256x10xf32> to vector<8x10xf32>
    %166 = arith.fptoui %165 : vector<8x10xf32> to vector<8x10xi8>
    %c3 = arith.constant 3 : index
    %c0_84 = arith.constant 0 : index
    %c0_85 = arith.constant 0 : index
    %167 = vector.load %arg4[%c3, %c0_84, %c0_85] : memref<32x8x10xi8, #tpu.memory_space<vmem>>, vector<1x8x10xi8>
    %168 = vector.shape_cast %167 : vector<1x8x10xi8> to vector<8x10xi8>
    %169 = vector.shape_cast %166 : vector<8x10xi8> to vector<1x8x10xi8>
    tpu.vector_store %arg4[%c3, %c0_84, %c0_85], %169 {strides = array<i32>} : memref<32x8x10xi8, #tpu.memory_space<vmem>>, vector<1x8x10xi8>,
    %170 = vector.extract_strided_slice %149 {offsets = [32, 0], sizes = [8, 10], strides = [1, 1]} : vector<256x10xf32> to vector<8x10xf32>
    %171 = arith.fptoui %170 : vector<8x10xf32> to vector<8x10xi8>
    %c4 = arith.constant 4 : index
    %c0_86 = arith.constant 0 : index
    %c0_87 = arith.constant 0 : index
    %172 = vector.load %arg4[%c4, %c0_86, %c0_87] : memref<32x8x10xi8, #tpu.memory_space<vmem>>, vector<1x8x10xi8>
    %173 = vector.shape_cast %172 : vector<1x8x10xi8> to vector<8x10xi8>
    %174 = vector.shape_cast %171 : vector<8x10xi8> to vector<1x8x10xi8>
    tpu.vector_store %arg4[%c4, %c0_86, %c0_87], %174 {strides = array<i32>} : memref<32x8x10xi8, #tpu.memory_space<vmem>>, vector<1x8x10xi8>,
    %175 = vector.extract_strided_slice %149 {offsets = [40, 0], sizes = [8, 10], strides = [1, 1]} : vector<256x10xf32> to vector<8x10xf32>
    %176 = arith.fptoui %175 : vector<8x10xf32> to vector<8x10xi8>
    %c5 = arith.constant 5 : index
    %c0_88 = arith.constant 0 : index
    %c0_89 = arith.constant 0 : index
    %177 = vector.load %arg4[%c5, %c0_88, %c0_89] : memref<32x8x10xi8, #tpu.memory_space<vmem>>, vector<1x8x10xi8>
    %178 = vector.shape_cast %177 : vector<1x8x10xi8> to vector<8x10xi8>
    %179 = vector.shape_cast %176 : vector<8x10xi8> to vector<1x8x10xi8>
    tpu.vector_store %arg4[%c5, %c0_88, %c0_89], %179 {strides = array<i32>} : memref<32x8x10xi8, #tpu.memory_space<vmem>>, vector<1x8x10xi8>,
    %180 = vector.extract_strided_slice %149 {offsets = [48, 0], sizes = [8, 10], strides = [1, 1]} : vector<256x10xf32> to vector<8x10xf32>
    %181 = arith.fptoui %180 : vector<8x10xf32> to vector<8x10xi8>
    %c6 = arith.constant 6 : index
    %c0_90 = arith.constant 0 : index
    %c0_91 = arith.constant 0 : index
    %182 = vector.load %arg4[%c6, %c0_90, %c0_91] : memref<32x8x10xi8, #tpu.memory_space<vmem>>, vector<1x8x10xi8>
    %183 = vector.shape_cast %182 : vector<1x8x10xi8> to vector<8x10xi8>
    %184 = vector.shape_cast %181 : vector<8x10xi8> to vector<1x8x10xi8>
    tpu.vector_store %arg4[%c6, %c0_90, %c0_91], %184 {strides = array<i32>} : memref<32x8x10xi8, #tpu.memory_space<vmem>>, vector<1x8x10xi8>,
    %185 = vector.extract_strided_slice %149 {offsets = [56, 0], sizes = [8, 10], strides = [1, 1]} : vector<256x10xf32> to vector<8x10xf32>
    %186 = arith.fptoui %185 : vector<8x10xf32> to vector<8x10xi8>
    %c7 = arith.constant 7 : index
    %c0_92 = arith.constant 0 : index
    %c0_93 = arith.constant 0 : index
    %187 = vector.load %arg4[%c7, %c0_92, %c0_93] : memref<32x8x10xi8, #tpu.memory_space<vmem>>, vector<1x8x10xi8>
    %188 = vector.shape_cast %187 : vector<1x8x10xi8> to vector<8x10xi8>
    %189 = vector.shape_cast %186 : vector<8x10xi8> to vector<1x8x10xi8>
    tpu.vector_store %arg4[%c7, %c0_92, %c0_93], %189 {strides = array<i32>} : memref<32x8x10xi8, #tpu.memory_space<vmem>>, vector<1x8x10xi8>,
    %190 = vector.extract_strided_slice %149 {offsets = [64, 0], sizes = [8, 10], strides = [1, 1]} : vector<256x10xf32> to vector<8x10xf32>
    %191 = arith.fptoui %190 : vector<8x10xf32> to vector<8x10xi8>
    %c8_94 = arith.constant 8 : index
    %c0_95 = arith.constant 0 : index
    %c0_96 = arith.constant 0 : index
    %192 = vector.load %arg4[%c8_94, %c0_95, %c0_96] : memref<32x8x10xi8, #tpu.memory_space<vmem>>, vector<1x8x10xi8>
    %193 = vector.shape_cast %192 : vector<1x8x10xi8> to vector<8x10xi8>
    %194 = vector.shape_cast %191 : vector<8x10xi8> to vector<1x8x10xi8>
    tpu.vector_store %arg4[%c8_94, %c0_95, %c0_96], %194 {strides = array<i32>} : memref<32x8x10xi8, #tpu.memory_space<vmem>>, vector<1x8x10xi8>,
    %195 = vector.extract_strided_slice %149 {offsets = [72, 0], sizes = [8, 10], strides = [1, 1]} : vector<256x10xf32> to vector<8x10xf32>
    %196 = arith.fptoui %195 : vector<8x10xf32> to vector<8x10xi8>
    %c9 = arith.constant 9 : index
    %c0_97 = arith.constant 0 : index
    %c0_98 = arith.constant 0 : index
    %197 = vector.load %arg4[%c9, %c0_97, %c0_98] : memref<32x8x10xi8, #tpu.memory_space<vmem>>, vector<1x8x10xi8>
    %198 = vector.shape_cast %197 : vector<1x8x10xi8> to vector<8x10xi8>
    %199 = vector.shape_cast %196 : vector<8x10xi8> to vector<1x8x10xi8>
    tpu.vector_store %arg4[%c9, %c0_97, %c0_98], %199 {strides = array<i32>} : memref<32x8x10xi8, #tpu.memory_space<vmem>>, vector<1x8x10xi8>,
    %200 = vector.extract_strided_slice %149 {offsets = [80, 0], sizes = [8, 10], strides = [1, 1]} : vector<256x10xf32> to vector<8x10xf32>
    %201 = arith.fptoui %200 : vector<8x10xf32> to vector<8x10xi8>
    %c10 = arith.constant 10 : index
    %c0_99 = arith.constant 0 : index
    %c0_100 = arith.constant 0 : index
    %202 = vector.load %arg4[%c10, %c0_99, %c0_100] : memref<32x8x10xi8, #tpu.memory_space<vmem>>, vector<1x8x10xi8>
    %203 = vector.shape_cast %202 : vector<1x8x10xi8> to vector<8x10xi8>
    %204 = vector.shape_cast %201 : vector<8x10xi8> to vector<1x8x10xi8>
    tpu.vector_store %arg4[%c10, %c0_99, %c0_100], %204 {strides = array<i32>} : memref<32x8x10xi8, #tpu.memory_space<vmem>>, vector<1x8x10xi8>,
    %205 = vector.extract_strided_slice %149 {offsets = [88, 0], sizes = [8, 10], strides = [1, 1]} : vector<256x10xf32> to vector<8x10xf32>
    %206 = arith.fptoui %205 : vector<8x10xf32> to vector<8x10xi8>
    %c11 = arith.constant 11 : index
    %c0_101 = arith.constant 0 : index
    %c0_102 = arith.constant 0 : index
    %207 = vector.load %arg4[%c11, %c0_101, %c0_102] : memref<32x8x10xi8, #tpu.memory_space<vmem>>, vector<1x8x10xi8>
    %208 = vector.shape_cast %207 : vector<1x8x10xi8> to vector<8x10xi8>
    %209 = vector.shape_cast %206 : vector<8x10xi8> to vector<1x8x10xi8>
    tpu.vector_store %arg4[%c11, %c0_101, %c0_102], %209 {strides = array<i32>} : memref<32x8x10xi8, #tpu.memory_space<vmem>>, vector<1x8x10xi8>,
    %210 = vector.extract_strided_slice %149 {offsets = [96, 0], sizes = [8, 10], strides = [1, 1]} : vector<256x10xf32> to vector<8x10xf32>
    %211 = arith.fptoui %210 : vector<8x10xf32> to vector<8x10xi8>
    %c12 = arith.constant 12 : index
    %c0_103 = arith.constant 0 : index
    %c0_104 = arith.constant 0 : index
    %212 = vector.load %arg4[%c12, %c0_103, %c0_104] : memref<32x8x10xi8, #tpu.memory_space<vmem>>, vector<1x8x10xi8>
    %213 = vector.shape_cast %212 : vector<1x8x10xi8> to vector<8x10xi8>
    %214 = vector.shape_cast %211 : vector<8x10xi8> to vector<1x8x10xi8>
    tpu.vector_store %arg4[%c12, %c0_103, %c0_104], %214 {strides = array<i32>} : memref<32x8x10xi8, #tpu.memory_space<vmem>>, vector<1x8x10xi8>,
    %215 = vector.extract_strided_slice %149 {offsets = [104, 0], sizes = [8, 10], strides = [1, 1]} : vector<256x10xf32> to vector<8x10xf32>
    %216 = arith.fptoui %215 : vector<8x10xf32> to vector<8x10xi8>
    %c13 = arith.constant 13 : index
    %c0_105 = arith.constant 0 : index
    %c0_106 = arith.constant 0 : index
    %217 = vector.load %arg4[%c13, %c0_105, %c0_106] : memref<32x8x10xi8, #tpu.memory_space<vmem>>, vector<1x8x10xi8>
    %218 = vector.shape_cast %217 : vector<1x8x10xi8> to vector<8x10xi8>
    %219 = vector.shape_cast %216 : vector<8x10xi8> to vector<1x8x10xi8>
    tpu.vector_store %arg4[%c13, %c0_105, %c0_106], %219 {strides = array<i32>} : memref<32x8x10xi8, #tpu.memory_space<vmem>>, vector<1x8x10xi8>,
    %220 = vector.extract_strided_slice %149 {offsets = [112, 0], sizes = [8, 10], strides = [1, 1]} : vector<256x10xf32> to vector<8x10xf32>
    %221 = arith.fptoui %220 : vector<8x10xf32> to vector<8x10xi8>
    %c14 = arith.constant 14 : index
    %c0_107 = arith.constant 0 : index
    %c0_108 = arith.constant 0 : index
    %222 = vector.load %arg4[%c14, %c0_107, %c0_108] : memref<32x8x10xi8, #tpu.memory_space<vmem>>, vector<1x8x10xi8>
    %223 = vector.shape_cast %222 : vector<1x8x10xi8> to vector<8x10xi8>
    %224 = vector.shape_cast %221 : vector<8x10xi8> to vector<1x8x10xi8>
    tpu.vector_store %arg4[%c14, %c0_107, %c0_108], %224 {strides = array<i32>} : memref<32x8x10xi8, #tpu.memory_space<vmem>>, vector<1x8x10xi8>,
    %225 = vector.extract_strided_slice %149 {offsets = [120, 0], sizes = [8, 10], strides = [1, 1]} : vector<256x10xf32> to vector<8x10xf32>
    %226 = arith.fptoui %225 : vector<8x10xf32> to vector<8x10xi8>
    %c15 = arith.constant 15 : index
    %c0_109 = arith.constant 0 : index
    %c0_110 = arith.constant 0 : index
    %227 = vector.load %arg4[%c15, %c0_109, %c0_110] : memref<32x8x10xi8, #tpu.memory_space<vmem>>, vector<1x8x10xi8>
    %228 = vector.shape_cast %227 : vector<1x8x10xi8> to vector<8x10xi8>
    %229 = vector.shape_cast %226 : vector<8x10xi8> to vector<1x8x10xi8>
    tpu.vector_store %arg4[%c15, %c0_109, %c0_110], %229 {strides = array<i32>} : memref<32x8x10xi8, #tpu.memory_space<vmem>>, vector<1x8x10xi8>,
    %230 = vector.extract_strided_slice %149 {offsets = [128, 0], sizes = [8, 10], strides = [1, 1]} : vector<256x10xf32> to vector<8x10xf32>
    %231 = arith.fptoui %230 : vector<8x10xf32> to vector<8x10xi8>
    %c16_111 = arith.constant 16 : index
    %c0_112 = arith.constant 0 : index
    %c0_113 = arith.constant 0 : index
    %232 = vector.load %arg4[%c16_111, %c0_112, %c0_113] : memref<32x8x10xi8, #tpu.memory_space<vmem>>, vector<1x8x10xi8>
    %233 = vector.shape_cast %232 : vector<1x8x10xi8> to vector<8x10xi8>
    %234 = vector.shape_cast %231 : vector<8x10xi8> to vector<1x8x10xi8>
    tpu.vector_store %arg4[%c16_111, %c0_112, %c0_113], %234 {strides = array<i32>} : memref<32x8x10xi8, #tpu.memory_space<vmem>>, vector<1x8x10xi8>,
    %235 = vector.extract_strided_slice %149 {offsets = [136, 0], sizes = [8, 10], strides = [1, 1]} : vector<256x10xf32> to vector<8x10xf32>
    %236 = arith.fptoui %235 : vector<8x10xf32> to vector<8x10xi8>
    %c17 = arith.constant 17 : index
    %c0_114 = arith.constant 0 : index
    %c0_115 = arith.constant 0 : index
    %237 = vector.load %arg4[%c17, %c0_114, %c0_115] : memref<32x8x10xi8, #tpu.memory_space<vmem>>, vector<1x8x10xi8>
    %238 = vector.shape_cast %237 : vector<1x8x10xi8> to vector<8x10xi8>
    %239 = vector.shape_cast %236 : vector<8x10xi8> to vector<1x8x10xi8>
    tpu.vector_store %arg4[%c17, %c0_114, %c0_115], %239 {strides = array<i32>} : memref<32x8x10xi8, #tpu.memory_space<vmem>>, vector<1x8x10xi8>,
    %240 = vector.extract_strided_slice %149 {offsets = [144, 0], sizes = [8, 10], strides = [1, 1]} : vector<256x10xf32> to vector<8x10xf32>
    %241 = arith.fptoui %240 : vector<8x10xf32> to vector<8x10xi8>
    %c18 = arith.constant 18 : index
    %c0_116 = arith.constant 0 : index
    %c0_117 = arith.constant 0 : index
    %242 = vector.load %arg4[%c18, %c0_116, %c0_117] : memref<32x8x10xi8, #tpu.memory_space<vmem>>, vector<1x8x10xi8>
    %243 = vector.shape_cast %242 : vector<1x8x10xi8> to vector<8x10xi8>
    %244 = vector.shape_cast %241 : vector<8x10xi8> to vector<1x8x10xi8>
    tpu.vector_store %arg4[%c18, %c0_116, %c0_117], %244 {strides = array<i32>} : memref<32x8x10xi8, #tpu.memory_space<vmem>>, vector<1x8x10xi8>,
    %245 = vector.extract_strided_slice %149 {offsets = [152, 0], sizes = [8, 10], strides = [1, 1]} : vector<256x10xf32> to vector<8x10xf32>
    %246 = arith.fptoui %245 : vector<8x10xf32> to vector<8x10xi8>
    %c19 = arith.constant 19 : index
    %c0_118 = arith.constant 0 : index
    %c0_119 = arith.constant 0 : index
    %247 = vector.load %arg4[%c19, %c0_118, %c0_119] : memref<32x8x10xi8, #tpu.memory_space<vmem>>, vector<1x8x10xi8>
    %248 = vector.shape_cast %247 : vector<1x8x10xi8> to vector<8x10xi8>
    %249 = vector.shape_cast %246 : vector<8x10xi8> to vector<1x8x10xi8>
    tpu.vector_store %arg4[%c19, %c0_118, %c0_119], %249 {strides = array<i32>} : memref<32x8x10xi8, #tpu.memory_space<vmem>>, vector<1x8x10xi8>,
    %250 = vector.extract_strided_slice %149 {offsets = [160, 0], sizes = [8, 10], strides = [1, 1]} : vector<256x10xf32> to vector<8x10xf32>
    %251 = arith.fptoui %250 : vector<8x10xf32> to vector<8x10xi8>
    %c20 = arith.constant 20 : index
    %c0_120 = arith.constant 0 : index
    %c0_121 = arith.constant 0 : index
    %252 = vector.load %arg4[%c20, %c0_120, %c0_121] : memref<32x8x10xi8, #tpu.memory_space<vmem>>, vector<1x8x10xi8>
    %253 = vector.shape_cast %252 : vector<1x8x10xi8> to vector<8x10xi8>
    %254 = vector.shape_cast %251 : vector<8x10xi8> to vector<1x8x10xi8>
    tpu.vector_store %arg4[%c20, %c0_120, %c0_121], %254 {strides = array<i32>} : memref<32x8x10xi8, #tpu.memory_space<vmem>>, vector<1x8x10xi8>,
    %255 = vector.extract_strided_slice %149 {offsets = [168, 0], sizes = [8, 10], strides = [1, 1]} : vector<256x10xf32> to vector<8x10xf32>
    %256 = arith.fptoui %255 : vector<8x10xf32> to vector<8x10xi8>
    %c21 = arith.constant 21 : index
    %c0_122 = arith.constant 0 : index
    %c0_123 = arith.constant 0 : index
    %257 = vector.load %arg4[%c21, %c0_122, %c0_123] : memref<32x8x10xi8, #tpu.memory_space<vmem>>, vector<1x8x10xi8>
    %258 = vector.shape_cast %257 : vector<1x8x10xi8> to vector<8x10xi8>
    %259 = vector.shape_cast %256 : vector<8x10xi8> to vector<1x8x10xi8>
    tpu.vector_store %arg4[%c21, %c0_122, %c0_123], %259 {strides = array<i32>} : memref<32x8x10xi8, #tpu.memory_space<vmem>>, vector<1x8x10xi8>,
    %260 = vector.extract_strided_slice %149 {offsets = [176, 0], sizes = [8, 10], strides = [1, 1]} : vector<256x10xf32> to vector<8x10xf32>
    %261 = arith.fptoui %260 : vector<8x10xf32> to vector<8x10xi8>
    %c22 = arith.constant 22 : index
    %c0_124 = arith.constant 0 : index
    %c0_125 = arith.constant 0 : index
    %262 = vector.load %arg4[%c22, %c0_124, %c0_125] : memref<32x8x10xi8, #tpu.memory_space<vmem>>, vector<1x8x10xi8>
    %263 = vector.shape_cast %262 : vector<1x8x10xi8> to vector<8x10xi8>
    %264 = vector.shape_cast %261 : vector<8x10xi8> to vector<1x8x10xi8>
    tpu.vector_store %arg4[%c22, %c0_124, %c0_125], %264 {strides = array<i32>} : memref<32x8x10xi8, #tpu.memory_space<vmem>>, vector<1x8x10xi8>,
    %265 = vector.extract_strided_slice %149 {offsets = [184, 0], sizes = [8, 10], strides = [1, 1]} : vector<256x10xf32> to vector<8x10xf32>
    %266 = arith.fptoui %265 : vector<8x10xf32> to vector<8x10xi8>
    %c23 = arith.constant 23 : index
    %c0_126 = arith.constant 0 : index
    %c0_127 = arith.constant 0 : index
    %267 = vector.load %arg4[%c23, %c0_126, %c0_127] : memref<32x8x10xi8, #tpu.memory_space<vmem>>, vector<1x8x10xi8>
    %268 = vector.shape_cast %267 : vector<1x8x10xi8> to vector<8x10xi8>
    %269 = vector.shape_cast %266 : vector<8x10xi8> to vector<1x8x10xi8>
    tpu.vector_store %arg4[%c23, %c0_126, %c0_127], %269 {strides = array<i32>} : memref<32x8x10xi8, #tpu.memory_space<vmem>>, vector<1x8x10xi8>,
    %270 = vector.extract_strided_slice %149 {offsets = [192, 0], sizes = [8, 10], strides = [1, 1]} : vector<256x10xf32> to vector<8x10xf32>
    %271 = arith.fptoui %270 : vector<8x10xf32> to vector<8x10xi8>
    %c24_128 = arith.constant 24 : index
    %c0_129 = arith.constant 0 : index
    %c0_130 = arith.constant 0 : index
    %272 = vector.load %arg4[%c24_128, %c0_129, %c0_130] : memref<32x8x10xi8, #tpu.memory_space<vmem>>, vector<1x8x10xi8>
    %273 = vector.shape_cast %272 : vector<1x8x10xi8> to vector<8x10xi8>
    %274 = vector.shape_cast %271 : vector<8x10xi8> to vector<1x8x10xi8>
    tpu.vector_store %arg4[%c24_128, %c0_129, %c0_130], %274 {strides = array<i32>} : memref<32x8x10xi8, #tpu.memory_space<vmem>>, vector<1x8x10xi8>,
    %275 = vector.extract_strided_slice %149 {offsets = [200, 0], sizes = [8, 10], strides = [1, 1]} : vector<256x10xf32> to vector<8x10xf32>
    %276 = arith.fptoui %275 : vector<8x10xf32> to vector<8x10xi8>
    %c25 = arith.constant 25 : index
    %c0_131 = arith.constant 0 : index
    %c0_132 = arith.constant 0 : index
    %277 = vector.load %arg4[%c25, %c0_131, %c0_132] : memref<32x8x10xi8, #tpu.memory_space<vmem>>, vector<1x8x10xi8>
    %278 = vector.shape_cast %277 : vector<1x8x10xi8> to vector<8x10xi8>
    %279 = vector.shape_cast %276 : vector<8x10xi8> to vector<1x8x10xi8>
    tpu.vector_store %arg4[%c25, %c0_131, %c0_132], %279 {strides = array<i32>} : memref<32x8x10xi8, #tpu.memory_space<vmem>>, vector<1x8x10xi8>,
    %280 = vector.extract_strided_slice %149 {offsets = [208, 0], sizes = [8, 10], strides = [1, 1]} : vector<256x10xf32> to vector<8x10xf32>
    %281 = arith.fptoui %280 : vector<8x10xf32> to vector<8x10xi8>
    %c26 = arith.constant 26 : index
    %c0_133 = arith.constant 0 : index
    %c0_134 = arith.constant 0 : index
    %282 = vector.load %arg4[%c26, %c0_133, %c0_134] : memref<32x8x10xi8, #tpu.memory_space<vmem>>, vector<1x8x10xi8>
    %283 = vector.shape_cast %282 : vector<1x8x10xi8> to vector<8x10xi8>
    %284 = vector.shape_cast %281 : vector<8x10xi8> to vector<1x8x10xi8>
    tpu.vector_store %arg4[%c26, %c0_133, %c0_134], %284 {strides = array<i32>} : memref<32x8x10xi8, #tpu.memory_space<vmem>>, vector<1x8x10xi8>,
    %285 = vector.extract_strided_slice %149 {offsets = [216, 0], sizes = [8, 10], strides = [1, 1]} : vector<256x10xf32> to vector<8x10xf32>
    %286 = arith.fptoui %285 : vector<8x10xf32> to vector<8x10xi8>
    %c27 = arith.constant 27 : index
    %c0_135 = arith.constant 0 : index
    %c0_136 = arith.constant 0 : index
    %287 = vector.load %arg4[%c27, %c0_135, %c0_136] : memref<32x8x10xi8, #tpu.memory_space<vmem>>, vector<1x8x10xi8>
    %288 = vector.shape_cast %287 : vector<1x8x10xi8> to vector<8x10xi8>
    %289 = vector.shape_cast %286 : vector<8x10xi8> to vector<1x8x10xi8>
    tpu.vector_store %arg4[%c27, %c0_135, %c0_136], %289 {strides = array<i32>} : memref<32x8x10xi8, #tpu.memory_space<vmem>>, vector<1x8x10xi8>,
    %290 = vector.extract_strided_slice %149 {offsets = [224, 0], sizes = [8, 10], strides = [1, 1]} : vector<256x10xf32> to vector<8x10xf32>
    %291 = arith.fptoui %290 : vector<8x10xf32> to vector<8x10xi8>
    %c28 = arith.constant 28 : index
    %c0_137 = arith.constant 0 : index
    %c0_138 = arith.constant 0 : index
    %292 = vector.load %arg4[%c28, %c0_137, %c0_138] : memref<32x8x10xi8, #tpu.memory_space<vmem>>, vector<1x8x10xi8>
    %293 = vector.shape_cast %292 : vector<1x8x10xi8> to vector<8x10xi8>
    %294 = vector.shape_cast %291 : vector<8x10xi8> to vector<1x8x10xi8>
    tpu.vector_store %arg4[%c28, %c0_137, %c0_138], %294 {strides = array<i32>} : memref<32x8x10xi8, #tpu.memory_space<vmem>>, vector<1x8x10xi8>,
    %295 = vector.extract_strided_slice %149 {offsets = [232, 0], sizes = [8, 10], strides = [1, 1]} : vector<256x10xf32> to vector<8x10xf32>
    %296 = arith.fptoui %295 : vector<8x10xf32> to vector<8x10xi8>
    %c29 = arith.constant 29 : index
    %c0_139 = arith.constant 0 : index
    %c0_140 = arith.constant 0 : index
    %297 = vector.load %arg4[%c29, %c0_139, %c0_140] : memref<32x8x10xi8, #tpu.memory_space<vmem>>, vector<1x8x10xi8>
    %298 = vector.shape_cast %297 : vector<1x8x10xi8> to vector<8x10xi8>
    %299 = vector.shape_cast %296 : vector<8x10xi8> to vector<1x8x10xi8>
    tpu.vector_store %arg4[%c29, %c0_139, %c0_140], %299 {strides = array<i32>} : memref<32x8x10xi8, #tpu.memory_space<vmem>>, vector<1x8x10xi8>,
    %300 = vector.extract_strided_slice %149 {offsets = [240, 0], sizes = [8, 10], strides = [1, 1]} : vector<256x10xf32> to vector<8x10xf32>
    %301 = arith.fptoui %300 : vector<8x10xf32> to vector<8x10xi8>
    %c30 = arith.constant 30 : index
    %c0_141 = arith.constant 0 : index
    %c0_142 = arith.constant 0 : index
    %302 = vector.load %arg4[%c30, %c0_141, %c0_142] : memref<32x8x10xi8, #tpu.memory_space<vmem>>, vector<1x8x10xi8>
    %303 = vector.shape_cast %302 : vector<1x8x10xi8> to vector<8x10xi8>
    %304 = vector.shape_cast %301 : vector<8x10xi8> to vector<1x8x10xi8>
    tpu.vector_store %arg4[%c30, %c0_141, %c0_142], %304 {strides = array<i32>} : memref<32x8x10xi8, #tpu.memory_space<vmem>>, vector<1x8x10xi8>,
    %305 = vector.extract_strided_slice %149 {offsets = [248, 0], sizes = [8, 10], strides = [1, 1]} : vector<256x10xf32> to vector<8x10xf32>
    %306 = arith.fptoui %305 : vector<8x10xf32> to vector<8x10xi8>
    %c31 = arith.constant 31 : index
    %c0_143 = arith.constant 0 : index
    %c0_144 = arith.constant 0 : index
    %307 = vector.load %arg4[%c31, %c0_143, %c0_144] : memref<32x8x10xi8, #tpu.memory_space<vmem>>, vector<1x8x10xi8>
    %308 = vector.shape_cast %307 : vector<1x8x10xi8> to vector<8x10xi8>
    %309 = vector.shape_cast %306 : vector<8x10xi8> to vector<1x8x10xi8>
    tpu.vector_store %arg4[%c31, %c0_143, %c0_144], %309 {strides = array<i32>} : memref<32x8x10xi8, #tpu.memory_space<vmem>>, vector<1x8x10xi8>,
    return
  }
  func.func @transform_0(%arg0: i32) -> (i32, i32) {
    %c0_i32 = arith.constant 0 : i32
    %c0_i32_0 = arith.constant 0 : i32
    %c0_i32_1 = arith.constant 0 : i32
    return %c0_i32, %c0_i32_0 : i32, i32
  }
  func.func @transform_1(%arg0: i32) -> (i32, i32) {
    %c0_i32 = arith.constant 0 : i32
    %c0_i32_0 = arith.constant 0 : i32
    %c0_i32_1 = arith.constant 0 : i32
    return %c0_i32, %c0_i32_0 : i32, i32
  }
  func.func @transform_2(%arg0: i32) -> (i32, i32, i32) {
    %c0_i32 = arith.constant 0 : i32
    %c0_i32_0 = arith.constant 0 : i32
    %c0_i32_1 = arith.constant 0 : i32
    return %arg0, %c0_i32, %c0_i32_0 : i32, i32, i32
  }
  func.func @transform_3(%arg0: i32) -> (i32, i32, i32) {
    %c0_i32 = arith.constant 0 : i32
    %c0_i32_0 = arith.constant 0 : i32
    %c0_i32_1 = arith.constant 0 : i32
    return %arg0, %c0_i32, %c0_i32_0 : i32, i32, i32
  }
}

</mosaic_0001>

<bundles_post_ra>
// kernel: tpu_custom_call.1
= control target key start
LH: loop header
LB: loop body
LE: loop exit
PB: predicated region body
PF: predicated region fallthrough
CT: control target
= control target key end

     0   :  { %s2098_s12 = smov 0   ;;  %s2341_s0 = inlined_call_operand.vmem [shape: s32[8,1], index: 0, kind: input, shape index: {}]   ;;  %s2342_s1 = inlined_call_operand.vmem [shape: s32[1,10], index: 1, kind: input, shape index: {}]   ;;  %s2343_s2 = inlined_call_operand.vmem [shape: u8[64,16,20], index: 2, kind: input, shape index: {}]   ;;  %s2344_s3 = inlined_call_operand.vmem [shape: u8[64,8,10], index: 3, kind: output, shape index: {}]  }
   0x1 LB: > { %s1635_s13 = sadd.s32 4294967295, %s2073_s12   ;;  %p1639_p0 = scmp.ge.s32.totalorder %s2073_s12, 1  ;;  %s2073_s12 = sphi %s2098_s12, %s13_s12  }
   0x2   : > { %p139_p1 = scmp.lt.s32.totalorder %s2073_s12, 3 }
   0x4   : > { %p140_p2 = pnand %p1639_p0, %p139_p1 }
   0x5   : > { %s1640_s16 = sshll.u32 (!%p140_p2), %s1635_s13, 5 }
   0x6   : > { %143 = sbr.rel (%p140_p2) target bundleno = 567 (0x237), region = 32  ;;  %p165_p3 = scmp.lt.s32.totalorder (!%p140_p2), %s1640_s16, 63 }
   0xb   : > { %v180_v0 = vld [vmem:[%s2341_s0] sm:$0xff]  ;;  %v2075_v1 = vmov 0   ;;  %s2346_s16 = smov (!%p165_p3, %s1640_s16), 63  ;;  %v178_v45 = vlaneseq  ;;  %v2076_v57 = vmov 0.0   ;;  %vm527_vm2 = vcmask 130048  }
   0xc   : > { %2065 = vset.pattern.permute.xlu0 %v2075_v1  ;;  %s1728_s17 = sshll.u32 %s2346_s16, 2  ;;  %v2122_v48 = vld [vmem:[%s2342_s1] ss:$0 sm:$0xff]  ;;  %vm1262_vm3 = vcmask 1041408   ;;  %vm544_vm7 = vcmask 162816   ;;  %s1644_s23 = sshll.u32 %s2346_s16, 1 }
   0xd   : > { %182 = vperm.xlu0 %2065, %v180_v0   ;;  %s2115_s20 = scalar_lea.vmem %s2343_s2, %s1728_s17  ;;  %v2125_v49 = vshrl.u32 %v178_v45, 7  ;;  %s2271_s26 = scalar_lea.vmem %s2344_s3, %s1644_s23  ;;  %vm1360_vm9 = vcmask 74752  }
   0xe   : > { %v1730_v2 = vld [vmem:[%s2115_s20] sm:$0xff]   ;;  %v1864_v3 = vld [vmem:[%s2115_s20 + $0x8] sm:$0xff]   ;;  %v1866_v52 = vld [vmem:[%s2115_s20 + $0x10] sm:$0xff]  }
   0xf   : > { %v1731_v4 = vunpack.c.0.s8 %v1730_v2  ;;  %v1732_v5 = vunpack.c.1.s8 %v1730_v2  ;;  %v1735_v6 = vunpack.c.2.s8 %v1730_v2  ;;  %v1736_v7 = vunpack.c.3.s8 %v1730_v2  ;;  %v1868_v53 = vld [vmem:[%s2115_s20 + $0x18] sm:$0xff]  }
  0x10   : > { %v1739_v8 = vunpack.c.0.s8 %v1864_v3  ;;  %v1740_v9 = vunpack.c.1.s8 %v1864_v3  ;;  %v1743_v10 = vunpack.c.2.s8 %v1864_v3  ;;  %v1744_v11 = vunpack.c.3.s8 %v1864_v3 }
  0x11   : > { %v329_v12 = vand.u32 255, %v1731_v4  ;;  %v330_v13 = vand.u32 255, %v1732_v5  ;;  %v331_v14 = vand.u32 255, %v1735_v6  ;;  %v332_v15 = vand.u32 255, %v1736_v7 }
  0x12   : > { %v333_v16 = vand.u32 255, %v1739_v8  ;;  %v334_v17 = vand.u32 255, %v1740_v9  ;;  %v335_v18 = vand.u32 255, %v1743_v10  ;;  %v336_v19 = vand.u32 255, %v1744_v11 }
  0x13   : > { %v393_v20 = vcvt.s32.f32 %v329_v12  ;;  %v394_v21 = vcvt.s32.f32 %v330_v13  ;;  %v395_v22 = vcvt.s32.f32 %v331_v14  ;;  %v396_v23 = vcvt.s32.f32 %v332_v15 }
  0x14   : > { %v397_v24 = vcvt.s32.f32 %v333_v16  ;;  %v398_v25 = vcvt.s32.f32 %v334_v17  ;;  %v399_v26 = vcvt.s32.f32 %v335_v18  ;;  %v400_v27 = vcvt.s32.f32 %v336_v19 }
  0x15   : > { %v457_v28 = vpack.c.bf16 %v393_v20, %v393_v20  ;;  %v458_v29 = vpack.c.bf16 %v394_v21, %v394_v21  ;;  %v459_v30 = vpack.c.bf16 %v395_v22, %v395_v22  ;;  %v460_v31 = vpack.c.bf16 %v396_v23, %v396_v23 }
  0x16   : > { %v461_v32 = vpack.c.bf16 %v397_v24, %v397_v24  ;;  %v462_v33 = vpack.c.bf16 %v398_v25, %v398_v25  ;;  %v463_v34 = vpack.c.bf16 %v399_v26, %v399_v26  ;;  %v464_v41 = vpack.c.bf16 %v400_v27, %v400_v27 }
  0x17   : > { %v523_v35 = vunpack.c.l.b16 %v457_v28  ;;  %v524_v36 = vunpack.c.l.b16 %v458_v29  ;;  %v548_v37 = vunpack.c.l.b16 %v459_v30  ;;  %v549_v38 = vunpack.c.l.b16 %v460_v31 }
  0x18   : > { %v568_v39 = vunpack.c.l.b16 %v461_v32  ;;  %v569_v40 = vunpack.c.l.b16 %v462_v33  ;;  %v588_v44 = vunpack.c.l.b16 %v463_v34  ;;  %v589_v47 = vunpack.c.l.b16 %v464_v41 }
  0x19   : > { %v525_v42 = vpack.c.b16 %v524_v36, %v523_v35  ;;  %v550_v43 = vpack.c.b16 %v549_v38, %v548_v37  ;;  %v190_v51 = vadd.s32 16, %v2125_v49  ;;  %v1747_v54 = vunpack.c.0.s8 %v1866_v52  ;;  %v1870_v37 = vld [vmem:[%s2115_s20 + $0x20] sm:$0xff]   ;;  %v1872_v38 = vld [vmem:[%s2115_s20 + $0x28] sm:$0xff]  }
  0x1a   : > { %v570_v46 = vpack.c.b16 %v569_v40, %v568_v39  ;;  %v590_v50 = vpack.c.b16 %v589_v47, %v588_v44  ;;  %v1748_v55 = vunpack.c.1.s8 %v1866_v52  ;;  %v1751_v56 = vunpack.c.2.s8 %v1866_v52 }
  0x1b   : > { %538 = vmatpush.bf16.msra.mxu0 %v525_v42  ;;  %559 = vmatpush.bf16.msra.mxu1 %v550_v43  ;;  %vm195_vm0 = vcmp.eq.s32.totalorder %v190_v51, %v2122_v48  ;;  %v1752_v59 = vunpack.c.3.s8 %v1866_v52  ;;  %v1755_v60 = vunpack.c.0.s8 %v1868_v53  ;;  %v1756_v61 = vunpack.c.1.s8 %v1868_v53 }
  0x1c   : > { %579 = vmatpush.bf16.msra.mxu2 %v570_v46  ;;  %599 = vmatpush.bf16.msra.mxu3 %v590_v50  ;;  %v2132_v58 = vsel %vm195_vm0, 1.0, %v2076_v57  ;;  %v337_v62 = vand.u32 255, %v1747_v54  ;;  %v338_v63 = vand.u32 255, %v1748_v55  ;;  %v339_v0 = vand.u32 255, %v1751_v56 }
  0x1d   : > { %v340_v1 = vand.u32 255, %v1752_v59  ;;  %v341_v2 = vand.u32 255, %v1755_v60  ;;  %v342_v3 = vand.u32 255, %v1756_v61  ;;  %v1759_v4 = vunpack.c.2.s8 %v1868_v53 }
  0x1e   : > { %v401_v5 = vcvt.s32.f32 %v337_v62  ;;  %v402_v6 = vcvt.s32.f32 %v338_v63  ;;  %v403_v7 = vcvt.s32.f32 %v339_v0  ;;  %v1760_v8 = vunpack.c.3.s8 %v1868_v53 }
  0x1f   : > { %v404_v9 = vcvt.s32.f32 %v340_v1  ;;  %v405_v10 = vcvt.s32.f32 %v341_v2  ;;  %v406_v11 = vcvt.s32.f32 %v342_v3  ;;  %v343_v12 = vand.u32 255, %v1759_v4 }
  0x20   : > { %v465_v13 = vpack.c.bf16 %v401_v5, %v401_v5  ;;  %v466_v14 = vpack.c.bf16 %v402_v6, %v402_v6  ;;  %v467_v15 = vpack.c.bf16 %v403_v7, %v403_v7  ;;  %v344_v16 = vand.u32 255, %v1760_v8 }
  0x21   : > { %v468_v17 = vpack.c.bf16 %v404_v9, %v404_v9  ;;  %v469_v18 = vpack.c.bf16 %v405_v10, %v405_v10  ;;  %v470_v19 = vpack.c.bf16 %v406_v11, %v406_v11  ;;  %v407_v20 = vcvt.s32.f32 %v343_v12 }
  0x22   : > { %v608_v21 = vunpack.c.l.b16 %v465_v13  ;;  %v609_v22 = vunpack.c.l.b16 %v466_v14  ;;  %v628_v23 = vunpack.c.l.b16 %v467_v15  ;;  %v408_v24 = vcvt.s32.f32 %v344_v16 }
  0x23   : > { %v629_v25 = vunpack.c.l.b16 %v468_v17  ;;  %v648_v26 = vunpack.c.l.b16 %v469_v18  ;;  %v649_v27 = vunpack.c.l.b16 %v470_v19  ;;  %v471_v28 = vpack.c.bf16 %v407_v20, %v407_v20 }
  0x24   : > { %v610_v29 = vpack.c.b16 %v609_v22, %v608_v21  ;;  %v472_v30 = vpack.c.bf16 %v408_v24, %v408_v24  ;;  %v179_v36 = vand.u32 127, %v178_v45  ;;  %v1763_v39 = vunpack.c.0.s8 %v1870_v37 }
  0x25   : > { %v630_v31 = vpack.c.b16 %v629_v25, %v628_v23  ;;  %v650_v32 = vpack.c.b16 %v649_v27, %v648_v26  ;;  %v668_v33 = vunpack.c.l.b16 %v471_v28  ;;  %v1764_v40 = vunpack.c.1.s8 %v1870_v37  ;;  %v1876_v26 = vld [vmem:[%s2115_s20 + $0x38] sm:$0xff]  }
  0x26   : > { %619 = vmatpush.bf16.msrb.mxu0 %v610_v29  ;;  %v669_v34 = vunpack.c.l.b16 %v472_v30  ;;  %v1767_v41 = vunpack.c.2.s8 %v1870_v37  ;;  %v1768_v42 = vunpack.c.3.s8 %v1870_v37  ;;  %v1771_v43 = vunpack.c.0.s8 %v1872_v38 }
  0x27   : > { %639 = vmatpush.bf16.msrb.mxu1 %v630_v31  ;;  %659 = vmatpush.bf16.msrb.mxu2 %v650_v32  ;;  %v1772_v44 = vunpack.c.1.s8 %v1872_v38  ;;  %v1775_v46 = vunpack.c.2.s8 %v1872_v38  ;;  %v1776_v47 = vunpack.c.3.s8 %v1872_v38  ;;  %v345_v50 = vand.u32 255, %v1763_v39 }
  0x28   : > { %v670_v35 = vpack.c.b16 %v669_v34, %v668_v33  ;;  %v346_v51 = vand.u32 255, %v1764_v40  ;;  %v347_v52 = vand.u32 255, %v1767_v41  ;;  %v348_v53 = vand.u32 255, %v1768_v42 }
  0x29   : > { %v349_v54 = vand.u32 255, %v1771_v43  ;;  %v350_v55 = vand.u32 255, %v1772_v44  ;;  %v351_v56 = vand.u32 255, %v1775_v46  ;;  %v352_v59 = vand.u32 255, %v1776_v47 }
  0x2a   : > { %679 = vmatpush.bf16.msrb.mxu3 %v670_v35  ;;  %v409_v45 = vcvt.s32.f32 %v345_v50  ;;  %v410_v60 = vcvt.s32.f32 %v346_v51  ;;  %v411_v61 = vcvt.s32.f32 %v347_v52  ;;  %v412_v62 = vcvt.s32.f32 %v348_v53 }
  0x2b   : > { %v413_v63 = vcvt.s32.f32 %v349_v54  ;;  %v414_v0 = vcvt.s32.f32 %v350_v55  ;;  %v415_v1 = vcvt.s32.f32 %v351_v56  ;;  %v416_v2 = vcvt.s32.f32 %v352_v59 }
  0x2c   : > { %v473_v3 = vpack.c.bf16 %v409_v45, %v409_v45  ;;  %v474_v4 = vpack.c.bf16 %v410_v60, %v410_v60  ;;  %v475_v5 = vpack.c.bf16 %v411_v61, %v411_v61  ;;  %v476_v6 = vpack.c.bf16 %v412_v62, %v412_v62 }
  0x2d   : > { %v477_v7 = vpack.c.bf16 %v413_v63, %v413_v63  ;;  %v478_v8 = vpack.c.bf16 %v414_v0, %v414_v0  ;;  %v479_v9 = vpack.c.bf16 %v415_v1, %v415_v1  ;;  %v480_v10 = vpack.c.bf16 %v416_v2, %v416_v2 }
  0x2e   : > { %v688_v11 = vunpack.c.l.b16 %v473_v3  ;;  %v689_v12 = vunpack.c.l.b16 %v474_v4  ;;  %v708_v13 = vunpack.c.l.b16 %v475_v5  ;;  %v709_v14 = vunpack.c.l.b16 %v476_v6 }
  0x2f   : > { %v728_v16 = vunpack.c.l.b16 %v477_v7  ;;  %v729_v17 = vunpack.c.l.b16 %v478_v8  ;;  %v748_v18 = vunpack.c.l.b16 %v479_v9  ;;  %v749_v19 = vunpack.c.l.b16 %v480_v10 }
  0x30   : > { %v690_v22 = vpack.c.b16 %v689_v12, %v688_v11  ;;  %v710_v23 = vpack.c.b16 %v709_v14, %v708_v13  ;;  %v1787_v31 = vunpack.c.0.s8 %v1876_v26  ;;  %v1788_v32 = vunpack.c.1.s8 %v1876_v26  ;;  %v1878_v11 = vld [vmem:[%s2115_s20 + $0x40] sm:$0xff]   ;;  %v1880_v12 = vld [vmem:[%s2115_s20 + $0x48] sm:$0xff]  }
  0x31   : > { %v730_v24 = vpack.c.b16 %v729_v17, %v728_v16  ;;  %v750_v25 = vpack.c.b16 %v749_v19, %v748_v18  ;;  %v1791_v33 = vunpack.c.2.s8 %v1876_v26  ;;  %v1792_v34 = vunpack.c.3.s8 %v1876_v26 }
  0x32   : > { %v357_v39 = vand.u32 255, %v1787_v31  ;;  %v358_v40 = vand.u32 255, %v1788_v32  ;;  %v1795_v13 = vunpack.c.0.s8 %v1878_v11  ;;  %v1796_v14 = vunpack.c.1.s8 %v1878_v11 }
  0x33   : > { %v359_v41 = vand.u32 255, %v1791_v33  ;;  %v360_v42 = vand.u32 255, %v1792_v34  ;;  %v1800_v16 = vunpack.c.3.s8 %v1878_v11  ;;  %v1803_v17 = vunpack.c.0.s8 %v1880_v12 }
  0x34   : > { %v421_v50 = vcvt.s32.f32 %v357_v39  ;;  %v422_v51 = vcvt.s32.f32 %v358_v40  ;;  %v1804_v18 = vunpack.c.1.s8 %v1880_v12  ;;  %v1807_v19 = vunpack.c.2.s8 %v1880_v12 }
  0x35   : > { %v423_v52 = vcvt.s32.f32 %v359_v41  ;;  %v424_v53 = vcvt.s32.f32 %v360_v42  ;;  %vm193_vm4 = vcmp.eq.s32.totalorder %v2125_v49, %v2122_v48 }
  0x36   : > { %v485_v45 = vpack.c.bf16 %v421_v50, %v421_v50  ;;  %v486_v60 = vpack.c.bf16 %v422_v51, %v422_v51  ;;  %v366_v26 = vand.u32 255, %v1804_v18 }
  0x37   : > { %v487_v61 = vpack.c.bf16 %v423_v52, %v423_v52  ;;  %v488_v62 = vpack.c.bf16 %v424_v53, %v424_v53 }
  0x38   : > { %v808_v3 = vunpack.c.l.b16 %v485_v45  ;;  %v809_v4 = vunpack.c.l.b16 %v486_v60  ;;  %v430_v34 = vcvt.s32.f32 %v366_v26 }
  0x39   : > { %v828_v5 = vunpack.c.l.b16 %v487_v61  ;;  %v829_v6 = vunpack.c.l.b16 %v488_v62  ;;  %v1882_v61 = vld [vmem:[%s2115_s20 + $0x50] sm:$0xff]   ;;  %v1884_v62 = vld [vmem:[%s2115_s20 + $0x58] sm:$0xff]  }
  0x3a   : > { %v810_v9 = vpack.c.b16 %v809_v4, %v808_v3  ;;  %v494_v42 = vpack.c.bf16 %v430_v34, %v430_v34  ;;  %v1819_v3 = vunpack.c.0.s8 %v1884_v62  ;;  %v1820_v4 = vunpack.c.1.s8 %v1884_v62 }
  0x3b   : > { %v830_v10 = vpack.c.b16 %v829_v6, %v828_v5  ;;  %v1823_v5 = vunpack.c.2.s8 %v1884_v62  ;;  %v1824_v6 = vunpack.c.3.s8 %v1884_v62 }
  0x3c   : > { %v889_v53 = vunpack.c.l.b16 %v494_v42 }
  0x7f   : > { %v183_v15 = vpop.permute.xlu0 %182 }
  0x80   : > { %vm184_vm1 = vcmp.eq.s32.totalorder %v179_v36, %v183_v15  ;;  %v1799_v15 = vunpack.c.2.s8 %v1878_v11  ;;  %v373_v11 = vand.u32 255, %v1819_v3 }
  0x81   : > { %v185_v20 = vsel %vm184_vm1, 1.0, %v2076_v57  ;;  %v1874_v57 = vld [vmem:[%s2115_s20 + $0x30] sm:$0xff]  }
  0x82   : > { %v2138_v21 = vpack.c.bf16 %v185_v20, %v185_v20  ;;  %v1779_v27 = vunpack.c.0.s8 %v1874_v57  ;;  %v1780_v28 = vunpack.c.1.s8 %v1874_v57  ;;  %v1783_v29 = vunpack.c.2.s8 %v1874_v57 }
  0x83   : > { %v1784_v30 = vunpack.c.3.s8 %v1874_v57  ;;  %v1808_v20 = vunpack.c.3.s8 %v1880_v12  ;;  %v365_v57 = vand.u32 255, %v1803_v17  ;;  %v374_v12 = vand.u32 255, %v1820_v4 }
  0x84   : > { %1645 = vmatmul.msk.bf16.vlgmr.msra.gmra.mxu0 %vm527_vm2, %v2138_v21  ;;  %1646 = vmatmul.msk.bf16.vlgmr.msra.gmra.mxu1 %vm527_vm2, %v2138_v21  ;;  %v353_v35 = vand.u32 255, %v1779_v27  ;;  %v354_v36 = vand.u32 255, %v1780_v28  ;;  %v355_v37 = vand.u32 255, %v1783_v29  ;;  %v367_v27 = vand.u32 255, %v1807_v19 }
  0x85   : > { %1647 = vmatmul.msk.bf16.vlgmr.msra.gmra.mxu2 %vm527_vm2, %v2138_v21  ;;  %1648 = vmatmul.msk.bf16.vlgmr.msra.gmra.mxu3 %vm527_vm2, %v2138_v21  ;;  %v356_v38 = vand.u32 255, %v1784_v30  ;;  %v368_v28 = vand.u32 255, %v1808_v20  ;;  %v429_v33 = vcvt.s32.f32 %v365_v57  ;;  %v437_v19 = vcvt.s32.f32 %v373_v11 }
  0x86   : > { %699 = vmatpush.bf16.msra.mxu0 %v690_v22  ;;  %719 = vmatpush.bf16.msra.mxu1 %v710_v23  ;;  %v417_v43 = vcvt.s32.f32 %v353_v35  ;;  %v418_v44 = vcvt.s32.f32 %v354_v36  ;;  %v419_v46 = vcvt.s32.f32 %v355_v37  ;;  %v361_v22 = vand.u32 255, %v1795_v13 }
  0x87   : > { %739 = vmatpush.bf16.msra.mxu2 %v730_v24  ;;  %759 = vmatpush.bf16.msra.mxu3 %v750_v25  ;;  %v420_v47 = vcvt.s32.f32 %v356_v38  ;;  %v362_v23 = vand.u32 255, %v1796_v14  ;;  %v363_v24 = vand.u32 255, %v1799_v15  ;;  %v364_v25 = vand.u32 255, %v1800_v16 }
  0x88   : > { %v481_v54 = vpack.c.bf16 %v417_v43, %v417_v43  ;;  %v482_v55 = vpack.c.bf16 %v418_v44, %v418_v44  ;;  %v483_v56 = vpack.c.bf16 %v419_v46, %v419_v46  ;;  %v425_v29 = vcvt.s32.f32 %v361_v22 }
  0x89   : > { %v484_v59 = vpack.c.bf16 %v420_v47, %v420_v47  ;;  %v426_v30 = vcvt.s32.f32 %v362_v23  ;;  %v427_v31 = vcvt.s32.f32 %v363_v24  ;;  %v428_v32 = vcvt.s32.f32 %v364_v25 }
  0x8a   : > { %v768_v63 = vunpack.c.l.b16 %v481_v54  ;;  %v769_v0 = vunpack.c.l.b16 %v482_v55  ;;  %v788_v1 = vunpack.c.l.b16 %v483_v56  ;;  %v431_v35 = vcvt.s32.f32 %v367_v27 }
  0x8b   : > { %v789_v2 = vunpack.c.l.b16 %v484_v59  ;;  %v432_v36 = vcvt.s32.f32 %v368_v28  ;;  %v489_v37 = vpack.c.bf16 %v425_v29, %v425_v29  ;;  %v490_v38 = vpack.c.bf16 %v426_v30, %v426_v30 }
  0x8c   : > { %v770_v7 = vpack.c.b16 %v769_v0, %v768_v63  ;;  %v491_v39 = vpack.c.bf16 %v427_v31, %v427_v31  ;;  %v492_v40 = vpack.c.bf16 %v428_v32, %v428_v32  ;;  %v493_v41 = vpack.c.bf16 %v429_v33, %v429_v33 }
  0x8d   : > { %v790_v8 = vpack.c.b16 %v789_v2, %v788_v1  ;;  %v495_v43 = vpack.c.bf16 %v431_v35, %v431_v35  ;;  %v496_v44 = vpack.c.bf16 %v432_v36, %v432_v36  ;;  %v848_v46 = vunpack.c.l.b16 %v489_v37 }
  0x8e   : > { %v849_v47 = vunpack.c.l.b16 %v490_v38  ;;  %v868_v50 = vunpack.c.l.b16 %v491_v39  ;;  %v869_v51 = vunpack.c.l.b16 %v492_v40  ;;  %v888_v52 = vunpack.c.l.b16 %v493_v41 }
  0x8f   : > { %v908_v54 = vunpack.c.l.b16 %v495_v43  ;;  %v909_v55 = vunpack.c.l.b16 %v496_v44  ;;  %v1811_v63 = vunpack.c.0.s8 %v1882_v61  ;;  %v1812_v0 = vunpack.c.1.s8 %v1882_v61  ;;  %v1886_v43 = vld [vmem:[%s2115_s20 + $0x60] sm:$0xff]   ;;  %v1888_v44 = vld [vmem:[%s2115_s20 + $0x68] sm:$0xff]  }
  0x90   : > { %v850_v56 = vpack.c.b16 %v849_v47, %v848_v46  ;;  %v870_v59 = vpack.c.b16 %v869_v51, %v868_v50  ;;  %v890_v45 = vpack.c.b16 %v889_v53, %v888_v52  ;;  %v1815_v1 = vunpack.c.2.s8 %v1882_v61 }
  0x91   : > { %v910_v60 = vpack.c.b16 %v909_v55, %v908_v54  ;;  %v1816_v2 = vunpack.c.3.s8 %v1882_v61  ;;  %v375_v13 = vand.u32 255, %v1823_v5  ;;  %v376_v14 = vand.u32 255, %v1824_v6 }
  0x92   : > { %v438_v20 = vcvt.s32.f32 %v374_v12  ;;  %v501_v27 = vpack.c.bf16 %v437_v19, %v437_v19  ;;  %v1827_v46 = vunpack.c.0.s8 %v1886_v43  ;;  %v1828_v47 = vunpack.c.1.s8 %v1886_v43 }
  0x93   : > { %v439_v22 = vcvt.s32.f32 %v375_v13  ;;  %v440_v23 = vcvt.s32.f32 %v376_v14  ;;  %v1831_v50 = vunpack.c.2.s8 %v1886_v43  ;;  %v1832_v51 = vunpack.c.3.s8 %v1886_v43 }
  0x94   : > { %1649 = vmatmul.msk.bf16.vlgmr.msrb.gmra.mxu0 %vm527_vm2, %v2138_v21  ;;  %1650 = vmatmul.msk.bf16.vlgmr.msrb.gmra.mxu1 %vm527_vm2, %v2138_v21  ;;  %v502_v28 = vpack.c.bf16 %v438_v20, %v438_v20  ;;  %v968_v35 = vunpack.c.l.b16 %v501_v27  ;;  %v1835_v52 = vunpack.c.0.s8 %v1888_v44  ;;  %v1836_v53 = vunpack.c.1.s8 %v1888_v44 }
  0x95   : > { %1651 = vmatmul.msk.bf16.vlgmr.msrb.gmra.mxu2 %vm527_vm2, %v2138_v21  ;;  %1652 = vmatmul.msk.bf16.vlgmr.msrb.gmra.mxu3 %vm527_vm2, %v2138_v21  ;;  %v503_v29 = vpack.c.bf16 %v439_v22, %v439_v22  ;;  %v504_v30 = vpack.c.bf16 %v440_v23, %v440_v23  ;;  %v1839_v54 = vunpack.c.2.s8 %v1888_v44  ;;  %v1840_v55 = vunpack.c.3.s8 %v1888_v44 }
  0x96   : > { %779 = vmatpush.bf16.msrb.mxu0 %v770_v7  ;;  %799 = vmatpush.bf16.msrb.mxu1 %v790_v8  ;;  %v369_v7 = vand.u32 255, %v1811_v63  ;;  %v370_v8 = vand.u32 255, %v1812_v0  ;;  %v969_v36 = vunpack.c.l.b16 %v502_v28  ;;  %v381_v61 = vand.u32 255, %v1835_v52 }
  0x97   : > { %819 = vmatpush.bf16.msrb.mxu2 %v810_v9  ;;  %839 = vmatpush.bf16.msrb.mxu3 %v830_v10  ;;  %v371_v9 = vand.u32 255, %v1815_v1  ;;  %v372_v10 = vand.u32 255, %v1816_v2  ;;  %v988_v37 = vunpack.c.l.b16 %v503_v29  ;;  %v989_v38 = vunpack.c.l.b16 %v504_v30  ;;  %v1890_v29 = vld [vmem:[%s2115_s20 + $0x70] sm:$0xff]   ;;  %v1892_v30 = vld [vmem:[%s2115_s20 + $0x78] sm:$0xff]  }
  0x98   : > { %v433_v15 = vcvt.s32.f32 %v369_v7  ;;  %v434_v16 = vcvt.s32.f32 %v370_v8  ;;  %v970_v41 = vpack.c.b16 %v969_v36, %v968_v35  ;;  %v382_v62 = vand.u32 255, %v1836_v53 }
  0x99   : > { %v435_v17 = vcvt.s32.f32 %v371_v9  ;;  %v436_v18 = vcvt.s32.f32 %v372_v10  ;;  %v990_v42 = vpack.c.b16 %v989_v38, %v988_v37  ;;  %v383_v63 = vand.u32 255, %v1839_v54 }
  0x9a   : > { %v497_v24 = vpack.c.bf16 %v433_v15, %v433_v15  ;;  %v498_v25 = vpack.c.bf16 %v434_v16, %v434_v16  ;;  %v384_v0 = vand.u32 255, %v1840_v55  ;;  %v445_v5 = vcvt.s32.f32 %v381_v61 }
  0x9b   : > { %v499_v57 = vpack.c.bf16 %v435_v17, %v435_v17  ;;  %v500_v26 = vpack.c.bf16 %v436_v18, %v436_v18  ;;  %v446_v6 = vcvt.s32.f32 %v382_v62  ;;  %v447_v7 = vcvt.s32.f32 %v383_v63 }
  0x9c   : > { %v928_v31 = vunpack.c.l.b16 %v497_v24  ;;  %v929_v32 = vunpack.c.l.b16 %v498_v25  ;;  %v448_v8 = vcvt.s32.f32 %v384_v0  ;;  %v509_v13 = vpack.c.bf16 %v445_v5, %v445_v5 }
  0x9d   : > { %v948_v33 = vunpack.c.l.b16 %v499_v57  ;;  %v949_v34 = vunpack.c.l.b16 %v500_v26  ;;  %v510_v14 = vpack.c.bf16 %v446_v6, %v446_v6  ;;  %v511_v15 = vpack.c.bf16 %v447_v7, %v447_v7 }
  0x9e   : > { %v930_v39 = vpack.c.b16 %v929_v32, %v928_v31  ;;  %v512_v16 = vpack.c.bf16 %v448_v8, %v448_v8  ;;  %v1048_v22 = vunpack.c.l.b16 %v509_v13  ;;  %v1843_v31 = vunpack.c.0.s8 %v1890_v29 }
  0x9f   : > { %v950_v40 = vpack.c.b16 %v949_v34, %v948_v33  ;;  %v1049_v23 = vunpack.c.l.b16 %v510_v14  ;;  %v1068_v24 = vunpack.c.l.b16 %v511_v15  ;;  %v1844_v32 = vunpack.c.1.s8 %v1890_v29 }
  0xa0   : > { %v1069_v25 = vunpack.c.l.b16 %v512_v16  ;;  %v1847_v33 = vunpack.c.2.s8 %v1890_v29  ;;  %v1848_v34 = vunpack.c.3.s8 %v1890_v29  ;;  %v1851_v35 = vunpack.c.0.s8 %v1892_v30 }
  0xa1   : > { %v1050_v27 = vpack.c.b16 %v1049_v23, %v1048_v22  ;;  %v1852_v36 = vunpack.c.1.s8 %v1892_v30  ;;  %v1855_v37 = vunpack.c.2.s8 %v1892_v30  ;;  %v1856_v38 = vunpack.c.3.s8 %v1892_v30 }
  0xa2   : > { %v1070_v28 = vpack.c.b16 %v1069_v25, %v1068_v24  ;;  %v389_v43 = vand.u32 255, %v1851_v35  ;;  %v200_v15 = vpack.c.bf16 %v2132_v58, %v2132_v58  ;;  %v2077_v58 = vmov 1.0|1.0  }
  0xa3   : > { %v390_v44 = vand.u32 255, %v1852_v36 }
  0xa4   : > { %1653 = vmatmul.msk.bf16.vlgmr.msra.gmra.mxu0 %vm527_vm2, %v2138_v21  ;;  %1654 = vmatmul.msk.bf16.vlgmr.msra.gmra.mxu1 %vm527_vm2, %v2138_v21  ;;  %v453_v54 = vcvt.s32.f32 %v389_v43  ;;  %v1264_v16 = vsel %vm1262_vm3, %v200_v15, 0 }
  0xa5   : > { %1655 = vmatmul.msk.bf16.vlgmr.msra.gmra.mxu2 %vm527_vm2, %v2138_v21  ;;  %1656 = vmatmul.msk.bf16.vlgmr.msra.gmra.mxu3 %vm527_vm2, %v2138_v21  ;;  %v454_v55 = vcvt.s32.f32 %v390_v44 }
  0xa6   : > { %859 = vmatpush.bf16.msra.mxu0 %v850_v56  ;;  %879 = vmatpush.bf16.msra.mxu1 %v870_v59  ;;  %v377_v56 = vand.u32 255, %v1827_v46  ;;  %v378_v59 = vand.u32 255, %v1828_v47  ;;  %v391_v46 = vand.u32 255, %v1855_v37  ;;  %v392_v47 = vand.u32 255, %v1856_v38 }
  0xa7   : > { %899 = vmatpush.bf16.msra.mxu2 %v890_v45  ;;  %919 = vmatpush.bf16.msra.mxu3 %v910_v60  ;;  %v379_v45 = vand.u32 255, %v1831_v50  ;;  %v380_v60 = vand.u32 255, %v1832_v51  ;;  %v517_v63 = vpack.c.bf16 %v453_v54, %v453_v54  ;;  %v518_v0 = vpack.c.bf16 %v454_v55, %v454_v55 }
  0xa8   : > { %v441_v1 = vcvt.s32.f32 %v377_v56  ;;  %v442_v2 = vcvt.s32.f32 %v378_v59  ;;  %v455_v56 = vcvt.s32.f32 %v391_v46  ;;  %v456_v59 = vcvt.s32.f32 %v392_v47 }
  0xa9   : > { %v443_v3 = vcvt.s32.f32 %v379_v45  ;;  %v444_v4 = vcvt.s32.f32 %v380_v60  ;;  %v1128_v7 = vunpack.c.l.b16 %v517_v63  ;;  %v1129_v8 = vunpack.c.l.b16 %v518_v0 }
  0xaa   : > { %v505_v9 = vpack.c.bf16 %v441_v1, %v441_v1  ;;  %v506_v10 = vpack.c.bf16 %v442_v2, %v442_v2  ;;  %v519_v1 = vpack.c.bf16 %v455_v56, %v455_v56  ;;  %v520_v2 = vpack.c.bf16 %v456_v59, %v456_v59 }
  0xab   : > { %v507_v11 = vpack.c.bf16 %v443_v3, %v443_v3  ;;  %v508_v12 = vpack.c.bf16 %v444_v4, %v444_v4  ;;  %v1130_v13 = vpack.c.b16 %v1129_v8, %v1128_v7 }
  0xac   : > { %v1008_v17 = vunpack.c.l.b16 %v505_v9  ;;  %v1009_v18 = vunpack.c.l.b16 %v506_v10  ;;  %v1148_v9 = vunpack.c.l.b16 %v519_v1  ;;  %v1149_v10 = vunpack.c.l.b16 %v520_v2 }
  0xad   : > { %v1028_v19 = vunpack.c.l.b16 %v507_v11  ;;  %v1029_v20 = vunpack.c.l.b16 %v508_v12 }
  0xae   : > { %v1010_v57 = vpack.c.b16 %v1009_v18, %v1008_v17  ;;  %v1150_v14 = vpack.c.b16 %v1149_v10, %v1148_v9  ;;  %v189_v17 = vadd.s32 8, %v2125_v49 }
  0xaf   : > { %v1030_v26 = vpack.c.b16 %v1029_v20, %v1028_v19 }
  0xb0   : > { %vm194_vm5 = vcmp.eq.s32.totalorder %v189_v17, %v2122_v48 }
  0xb1   : > { %vm1677_vm6 = vmpackc.low %vm194_vm5, %vm193_vm4 }
  0xb4   : > { %1657 = vmatmul.msk.bf16.vlgmr.msrb.gmra.mxu0 %vm527_vm2, %v2138_v21  ;;  %1658 = vmatmul.msk.bf16.vlgmr.msrb.gmra.mxu1 %vm527_vm2, %v2138_v21 }
  0xb5   : > { %1659 = vmatmul.msk.bf16.vlgmr.msrb.gmra.mxu2 %vm527_vm2, %v2138_v21  ;;  %1660 = vmatmul.msk.bf16.vlgmr.msrb.gmra.mxu3 %vm527_vm2, %v2138_v21 }
  0xb6   : > { %939 = vmatpush.bf16.msrb.mxu0 %v930_v39  ;;  %959 = vmatpush.bf16.msrb.mxu1 %v950_v40  ;;  %v385_v39 = vand.u32 255, %v1843_v31  ;;  %v386_v40 = vand.u32 255, %v1844_v32 }
  0xb7   : > { %979 = vmatpush.bf16.msrb.mxu2 %v970_v41  ;;  %999 = vmatpush.bf16.msrb.mxu3 %v990_v42  ;;  %v387_v41 = vand.u32 255, %v1847_v33  ;;  %v388_v42 = vand.u32 255, %v1848_v34 }
  0xb8   : > { %v449_v50 = vcvt.s32.f32 %v385_v39  ;;  %v450_v51 = vcvt.s32.f32 %v386_v40 }
  0xb9   : > { %v451_v52 = vcvt.s32.f32 %v387_v41  ;;  %v452_v53 = vcvt.s32.f32 %v388_v42 }
  0xba   : > { %v513_v45 = vpack.c.bf16 %v449_v50, %v449_v50  ;;  %v514_v60 = vpack.c.bf16 %v450_v51, %v450_v51 }
  0xbb   : > { %v515_v61 = vpack.c.bf16 %v451_v52, %v451_v52  ;;  %v516_v62 = vpack.c.bf16 %v452_v53, %v452_v53 }
  0xbc   : > { %v1088_v3 = vunpack.c.l.b16 %v513_v45  ;;  %v1089_v4 = vunpack.c.l.b16 %v514_v60 }
  0xbd   : > { %v1108_v5 = vunpack.c.l.b16 %v515_v61  ;;  %v1109_v6 = vunpack.c.l.b16 %v516_v62 }
  0xbe   : > { %v1090_v11 = vpack.c.b16 %v1089_v4, %v1088_v3 }
  0xbf   : > { %v1110_v12 = vpack.c.b16 %v1109_v6, %v1108_v5 }
  0xc4   : > { %1661 = vmatmul.msk.bf16.vlgmr.msra.gmra.mxu0 %vm527_vm2, %v2138_v21  ;;  %1662 = vmatmul.msk.bf16.vlgmr.msra.gmra.mxu1 %vm527_vm2, %v2138_v21 }
  0xc5   : > { %1663 = vmatmul.msk.bf16.vlgmr.msra.gmra.mxu2 %vm527_vm2, %v2138_v21  ;;  %1664 = vmatmul.msk.bf16.vlgmr.msra.gmra.mxu3 %vm527_vm2, %v2138_v21 }
  0xc6   : > { %1019 = vmatpush.bf16.msra.mxu0 %v1010_v57  ;;  %1039 = vmatpush.bf16.msra.mxu1 %v1030_v26 }
  0xc7   : > { %1059 = vmatpush.bf16.msra.mxu2 %v1050_v27  ;;  %1079 = vmatpush.bf16.msra.mxu3 %v1070_v28 }
  0xd4   : > { %1665 = vmatmul.msk.bf16.vlgmr.msrb.gmra.mxu0 %vm527_vm2, %v2138_v21  ;;  %1666 = vmatmul.msk.bf16.vlgmr.msrb.gmra.mxu1 %vm527_vm2, %v2138_v21 }
  0xd5   : > { %1667 = vmatmul.msk.bf16.vlgmr.msrb.gmra.mxu2 %vm527_vm2, %v2138_v21  ;;  %1668 = vmatmul.msk.bf16.vlgmr.msrb.gmra.mxu3 %vm527_vm2, %v2138_v21 }
  0xd6   : > { %1099 = vmatpush.bf16.msrb.mxu0 %v1090_v11  ;;  %1119 = vmatpush.bf16.msrb.mxu1 %v1110_v12 }
  0xd7   : > { %1139 = vmatpush.bf16.msrb.mxu2 %v1130_v13  ;;  %1159 = vmatpush.bf16.msrb.mxu3 %v1150_v14 }
  0xe4   : > { %1669 = vmatmul.msk.bf16.vlgmr.msra.gmra.mxu0 %vm527_vm2, %v2138_v21  ;;  %1670 = vmatmul.msk.bf16.vlgmr.msra.gmra.mxu1 %vm527_vm2, %v2138_v21 }
  0xe5   : > { %1671 = vmatmul.msk.bf16.vlgmr.msra.gmra.mxu2 %vm527_vm2, %v2138_v21  ;;  %1672 = vmatmul.msk.bf16.vlgmr.msra.gmra.mxu3 %vm527_vm2, %v2138_v21 }
  0xe6   : > { %1272 = vmatpush.bf16.msra.mxu0 %v1264_v16  ;;  %1857 = vmatpush.bf16.msra.mxu1 %v1264_v16 }
  0xe7   : > { %1858 = vmatpush.bf16.msra.mxu2 %v1264_v16  ;;  %1859 = vmatpush.bf16.msra.mxu3 %v1264_v16 }
  0xea   : > { %1678 = vmatpush.bf16.msk.msra.mxu0 %vm1677_vm6, %v2077_v58  ;;  %1860 = vmatpush.bf16.msk.msra.mxu1 %vm1677_vm6, %v2077_v58 }
  0xeb   : > { %1861 = vmatpush.bf16.msk.msra.mxu2 %vm1677_vm6, %v2077_v58  ;;  %1862 = vmatpush.bf16.msk.msra.mxu3 %vm1677_vm6, %v2077_v58 }
  0xf4   : > { %1673 = vmatmul.msk.bf16.vlgmr.msrb.gmra.mxu0 %vm527_vm2, %v2138_v21  ;;  %1674 = vmatmul.msk.bf16.vlgmr.msrb.gmra.mxu1 %vm527_vm2, %v2138_v21 }
  0xf5   : > { %1675 = vmatmul.msk.bf16.vlgmr.msrb.gmra.mxu2 %vm527_vm2, %v2138_v21  ;;  %1676 = vmatmul.msk.bf16.vlgmr.msrb.gmra.mxu3 %vm527_vm2, %v2138_v21 }
 0x101   : > { %v540_v48 = vpop.f32.mrf.mxu0  ;;  %v561_v49 = vpop.f32.mrf.mxu1 }
 0x102   : > { %545 = vst.msk [vmem:[#allocation2] sm:$0xff] %vm544_vm7, %v540_v48 }
 0x103   : > { %565 = vst.msk [vmem:[#allocation2 + $0x8] sm:$0xff] %vm544_vm7, %v561_v49 }
 0x108   : > { %v581_v18 = vpop.f32.mrf.mxu2  ;;  %v601_v19 = vpop.f32.mrf.mxu3 }
 0x109   : > { %585 = vst.msk [vmem:[#allocation2 + $0x10] sm:$0xff] %vm544_vm7, %v581_v18  ;;  %v542_v20 = vpop.f32.mrf.mxu0  ;;  %v563_v22 = vpop.f32.mrf.mxu1  ;;  %v1166_v23 = vld [vmem:[#allocation2] sm:$0xff] }
 0x10a   : > { %605 = vst.msk [vmem:[#allocation2 + $0x18] sm:$0xff] %vm544_vm7, %v601_v19  ;;  %v1167_v24 = vld [vmem:[#allocation2 + $0x8] sm:$0xff] }
 0x10b   : > { %v1198_v25 = vpack.c.bf16 %v1167_v24, %v1166_v23 }
 0x10d   : > { %1679 = vmatmul.msk.bf16.vlgmr.msra.gmra.mxu0 %vm544_vm7, %v1198_v25 }
 0x110   : > { %v583_v21 = vpop.f32.mrf.mxu2  ;;  %v603_v57 = vpop.f32.mrf.mxu3  ;;  %v1168_v30 = vld [vmem:[#allocation2 + $0x10] sm:$0xff] }
 0x111   : > { %v621_v26 = vpop.f32.mrf.mxu0  ;;  %v641_v27 = vpop.f32.mrf.mxu1  ;;  %v1169_v31 = vld [vmem:[#allocation2 + $0x18] sm:$0xff] }
 0x112   : > { %625 = vst.msk [vmem:[#allocation2 + $0x20] sm:$0xff] %vm544_vm7, %v621_v26  ;;  %v1199_v34 = vpack.c.bf16 %v1169_v31, %v1168_v30 }
 0x113   : > { %645 = vst.msk [vmem:[#allocation2 + $0x28] sm:$0xff] %vm544_vm7, %v641_v27 }
 0x118   : > { %v661_v28 = vpop.f32.mrf.mxu2  ;;  %v681_v29 = vpop.f32.mrf.mxu3 }
 0x119   : > { %665 = vst.msk [vmem:[#allocation2 + $0x30] sm:$0xff] %vm544_vm7, %v661_v28  ;;  %v623_v32 = vpop.f32.mrf.mxu0  ;;  %v643_v33 = vpop.f32.mrf.mxu1  ;;  %v1170_v41 = vld [vmem:[#allocation2 + $0x20] sm:$0xff] }
 0x11a   : > { %685 = vst.msk [vmem:[#allocation2 + $0x38] sm:$0xff] %vm544_vm7, %v681_v29  ;;  %v1171_v42 = vld [vmem:[#allocation2 + $0x28] sm:$0xff] }
 0x11b   : > { %v1200_v50 = vpack.c.bf16 %v1171_v42, %v1170_v41 }
 0x11d   : > { %1680 = vmatmul.msk.bf16.gmra.mxu0 %vm544_vm7, %v1199_v34 }
 0x120   : > { %v663_v35 = vpop.f32.mrf.mxu2  ;;  %v683_v36 = vpop.f32.mrf.mxu3  ;;  %v1172_v56 = vld [vmem:[#allocation2 + $0x30] sm:$0xff] }
 0x121   : > { %v701_v37 = vpop.f32.mrf.mxu0  ;;  %v721_v38 = vpop.f32.mrf.mxu1  ;;  %v1173_v60 = vld [vmem:[#allocation2 + $0x38] sm:$0xff] }
 0x122   : > { %705 = vst.msk [vmem:[#allocation2 + $0x40] sm:$0xff] %vm544_vm7, %v701_v37  ;;  %v1201_v1 = vpack.c.bf16 %v1173_v60, %v1172_v56 }
 0x123   : > { %725 = vst.msk [vmem:[#allocation2 + $0x48] sm:$0xff] %vm544_vm7, %v721_v38 }
 0x128   : > { %v741_v39 = vpop.f32.mrf.mxu2  ;;  %v761_v40 = vpop.f32.mrf.mxu3 }
 0x129   : > { %745 = vst.msk [vmem:[#allocation2 + $0x50] sm:$0xff] %vm544_vm7, %v741_v39  ;;  %v703_v43 = vpop.f32.mrf.mxu0  ;;  %v723_v44 = vpop.f32.mrf.mxu1  ;;  %v1174_v46 = vld [vmem:[#allocation2 + $0x40] sm:$0xff] }
 0x12a   : > { %765 = vst.msk [vmem:[#allocation2 + $0x58] sm:$0xff] %vm544_vm7, %v761_v40  ;;  %v1175_v47 = vld [vmem:[#allocation2 + $0x48] sm:$0xff] }
 0x12b   : > { %v1202_v51 = vpack.c.bf16 %v1175_v47, %v1174_v46 }
 0x12d   : > { %1681 = vmatmul.msk.bf16.gmra.mxu0 %vm544_vm7, %v1200_v50  ;;  %1683 = vmatmul.msk.bf16.vlgmr.msra.gmra.mxu1 %vm544_vm7, %v1202_v51 }
 0x130   : > { %v743_v52 = vpop.f32.mrf.mxu2  ;;  %v763_v53 = vpop.f32.mrf.mxu3  ;;  %v1176_v61 = vld [vmem:[#allocation2 + $0x50] sm:$0xff] }
 0x131   : > { %v781_v54 = vpop.f32.mrf.mxu0  ;;  %v801_v55 = vpop.f32.mrf.mxu1  ;;  %v1177_v62 = vld [vmem:[#allocation2 + $0x58] sm:$0xff] }
 0x132   : > { %785 = vst.msk [vmem:[#allocation2 + $0x60] sm:$0xff] %vm544_vm7, %v781_v54  ;;  %v1203_v2 = vpack.c.bf16 %v1177_v62, %v1176_v61 }
 0x133   : > { %805 = vst.msk [vmem:[#allocation2 + $0x68] sm:$0xff] %vm544_vm7, %v801_v55 }
 0x138   : > { %v821_v59 = vpop.f32.mrf.mxu2  ;;  %v841_v45 = vpop.f32.mrf.mxu3 }
 0x139   : > { %825 = vst.msk [vmem:[#allocation2 + $0x70] sm:$0xff] %vm544_vm7, %v821_v59  ;;  %v783_v63 = vpop.f32.mrf.mxu0  ;;  %v803_v0 = vpop.f32.mrf.mxu1  ;;  %v1178_v9 = vld [vmem:[#allocation2 + $0x60] sm:$0xff] }
 0x13a   : > { %845 = vst.msk [vmem:[#allocation2 + $0x78] sm:$0xff] %vm544_vm7, %v841_v45  ;;  %v1179_v10 = vld [vmem:[#allocation2 + $0x68] sm:$0xff] }
 0x13b   : > { %v1204_v15 = vpack.c.bf16 %v1179_v10, %v1178_v9 }
 0x13d   : > { %1682 = vmatmul.msk.bf16.gmra.mxu0 %vm544_vm7, %v1201_v1  ;;  %1684 = vmatmul.msk.bf16.gmra.mxu1 %vm544_vm7, %v1203_v2 }
 0x140   : > { %v823_v3 = vpop.f32.mrf.mxu2  ;;  %v843_v4 = vpop.f32.mrf.mxu3  ;;  %v1180_v18 = vld [vmem:[#allocation2 + $0x70] sm:$0xff] }
 0x141   : > { %v861_v5 = vpop.f32.mrf.mxu0  ;;  %v881_v6 = vpop.f32.mrf.mxu1  ;;  %v1181_v22 = vld [vmem:[#allocation2 + $0x78] sm:$0xff] }
 0x142   : > { %865 = vst.msk [vmem:[#allocation2 + $0x80] sm:$0xff] %vm544_vm7, %v861_v5  ;;  %v1205_v57 = vpack.c.bf16 %v1181_v22, %v1180_v18 }
 0x143   : > { %885 = vst.msk [vmem:[#allocation2 + $0x88] sm:$0xff] %vm544_vm7, %v881_v6 }
 0x148   : > { %v901_v7 = vpop.f32.mrf.mxu2  ;;  %v921_v8 = vpop.f32.mrf.mxu3 }
 0x149   : > { %905 = vst.msk [vmem:[#allocation2 + $0x90] sm:$0xff] %vm544_vm7, %v901_v7  ;;  %v863_v11 = vpop.f32.mrf.mxu0  ;;  %v883_v12 = vpop.f32.mrf.mxu1  ;;  %v1182_v13 = vld [vmem:[#allocation2 + $0x80] sm:$0xff] }
 0x14a   : > { %925 = vst.msk [vmem:[#allocation2 + $0x98] sm:$0xff] %vm544_vm7, %v921_v8  ;;  %v1183_v14 = vld [vmem:[#allocation2 + $0x88] sm:$0xff] }
 0x14b   : > { %v1206_v16 = vpack.c.bf16 %v1183_v14, %v1182_v13 }
 0x14d   : > { %1685 = vmatmul.msk.bf16.gmra.mxu1 %vm544_vm7, %v1204_v15  ;;  %1687 = vmatmul.msk.bf16.vlgmr.msra.gmra.mxu2 %vm544_vm7, %v1206_v16 }
 0x150   : > { %v903_v17 = vpop.f32.mrf.mxu2  ;;  %v923_v58 = vpop.f32.mrf.mxu3  ;;  %v1184_v23 = vld [vmem:[#allocation2 + $0x90] sm:$0xff] }
 0x151   : > { %v941_v48 = vpop.f32.mrf.mxu0  ;;  %v961_v49 = vpop.f32.mrf.mxu1  ;;  %v1185_v24 = vld [vmem:[#allocation2 + $0x98] sm:$0xff] }
 0x152   : > { %945 = vst.msk [vmem:[#allocation2 + $0xa0] sm:$0xff] %vm544_vm7, %v941_v48  ;;  %v1207_v26 = vpack.c.bf16 %v1185_v24, %v1184_v23 }
 0x153   : > { %965 = vst.msk [vmem:[#allocation2 + $0xa8] sm:$0xff] %vm544_vm7, %v961_v49 }
 0x158   : > { %v981_v19 = vpop.f32.mrf.mxu2  ;;  %v1001_v20 = vpop.f32.mrf.mxu3 }
 0x159   : > { %985 = vst.msk [vmem:[#allocation2 + $0xb0] sm:$0xff] %vm544_vm7, %v981_v19  ;;  %v943_v25 = vpop.f32.mrf.mxu0  ;;  %v963_v21 = vpop.f32.mrf.mxu1  ;;  %v1186_v33 = vld [vmem:[#allocation2 + $0xa0] sm:$0xff] }
 0x15a   : > { %1005 = vst.msk [vmem:[#allocation2 + $0xb8] sm:$0xff] %vm544_vm7, %v1001_v20  ;;  %v1187_v34 = vld [vmem:[#allocation2 + $0xa8] sm:$0xff] }
 0x15b   : > { %v1208_v39 = vpack.c.bf16 %v1187_v34, %v1186_v33 }
 0x15d   : > { %1686 = vmatmul.msk.bf16.gmra.mxu1 %vm544_vm7, %v1205_v57  ;;  %1688 = vmatmul.msk.bf16.gmra.mxu2 %vm544_vm7, %v1207_v26 }
 0x160   : > { %v983_v27 = vpop.f32.mrf.mxu2  ;;  %v1003_v28 = vpop.f32.mrf.mxu3  ;;  %v1188_v46 = vld [vmem:[#allocation2 + $0xb0] sm:$0xff] }
 0x161   : > { %v1021_v29 = vpop.f32.mrf.mxu0  ;;  %v1041_v30 = vpop.f32.mrf.mxu1  ;;  %v1189_v51 = vld [vmem:[#allocation2 + $0xb8] sm:$0xff] }
 0x162   : > { %1025 = vst.msk [vmem:[#allocation2 + $0xc0] sm:$0xff] %vm544_vm7, %v1021_v29  ;;  %v1209_v56 = vpack.c.bf16 %v1189_v51, %v1188_v46 }
 0x163   : > { %1045 = vst.msk [vmem:[#allocation2 + $0xc8] sm:$0xff] %vm544_vm7, %v1041_v30 }
 0x168   : > { %v1061_v31 = vpop.f32.mrf.mxu2  ;;  %v1081_v32 = vpop.f32.mrf.mxu3 }
 0x169   : > { %1065 = vst.msk [vmem:[#allocation2 + $0xd0] sm:$0xff] %vm544_vm7, %v1061_v31  ;;  %v1023_v35 = vpop.f32.mrf.mxu0  ;;  %v1043_v36 = vpop.f32.mrf.mxu1  ;;  %v1190_v37 = vld [vmem:[#allocation2 + $0xc0] sm:$0xff] }
 0x16a   : > { %1085 = vst.msk [vmem:[#allocation2 + $0xd8] sm:$0xff] %vm544_vm7, %v1081_v32  ;;  %v1191_v38 = vld [vmem:[#allocation2 + $0xc8] sm:$0xff] }
 0x16b   : > { %v1210_v40 = vpack.c.bf16 %v1191_v38, %v1190_v37 }
 0x16d   : > { %1689 = vmatmul.msk.bf16.gmra.mxu2 %vm544_vm7, %v1208_v39  ;;  %1691 = vmatmul.msk.bf16.vlgmr.msra.gmra.mxu3 %vm544_vm7, %v1210_v40 }
 0x170   : > { %v1063_v41 = vpop.f32.mrf.mxu2  ;;  %v1083_v42 = vpop.f32.mrf.mxu3  ;;  %v1192_v52 = vld [vmem:[#allocation2 + $0xd0] sm:$0xff] }
 0x171   : > { %v1101_v43 = vpop.f32.mrf.mxu0  ;;  %v1121_v44 = vpop.f32.mrf.mxu1  ;;  %v1193_v53 = vld [vmem:[#allocation2 + $0xd8] sm:$0xff] }
 0x172   : > { %1105 = vst.msk [vmem:[#allocation2 + $0xe0] sm:$0xff] %vm544_vm7, %v1101_v43  ;;  %v1211_v59 = vpack.c.bf16 %v1193_v53, %v1192_v52 }
 0x173   : > { %1125 = vst.msk [vmem:[#allocation2 + $0xe8] sm:$0xff] %vm544_vm7, %v1121_v44 }
 0x178   : > { %v1141_v47 = vpop.f32.mrf.mxu2  ;;  %v1161_v50 = vpop.f32.mrf.mxu3 }
 0x179   : > { %1145 = vst.msk [vmem:[#allocation2 + $0xf0] sm:$0xff] %vm544_vm7, %v1141_v47  ;;  %v1103_v54 = vpop.f32.mrf.mxu0  ;;  %v1123_v55 = vpop.f32.mrf.mxu1  ;;  %v1194_v61 = vld [vmem:[#allocation2 + $0xe0] sm:$0xff] }
 0x17a   : > { %1165 = vst.msk [vmem:[#allocation2 + $0xf8] sm:$0xff] %vm544_vm7, %v1161_v50  ;;  %v1195_v62 = vld [vmem:[#allocation2 + $0xe8] sm:$0xff] }
 0x17b   : > { %v1212_v1 = vpack.c.bf16 %v1195_v62, %v1194_v61 }
 0x17d   : > { %1690 = vmatmul.msk.bf16.gmra.mxu2 %vm544_vm7, %v1209_v56  ;;  %1692 = vmatmul.msk.bf16.gmra.mxu3 %vm544_vm7, %v1211_v59 }
 0x180   : > { %v1143_v45 = vpop.f32.mrf.mxu2  ;;  %v1163_v60 = vpop.f32.mrf.mxu3  ;;  %v1196_v14 = vld [vmem:[#allocation2 + $0xf0] sm:$0xff] }
 0x181   : > { %v1197_v15 = vld [vmem:[#allocation2 + $0xf8] sm:$0xff] }
 0x182   : > { %v1213_v49 = vpack.c.bf16 %v1197_v15, %v1196_v14 }
 0x18a   : > { %v1275_v63 = vpop.f32.mrf.mxu0 }
 0x18b   : > { %v1355_v0 = vmax.f32 %v1275_v63, 0.0 }
 0x18d   : > { %v1356_v2 = vmin.f32 %v1355_v0, 255.0  ;;  %1693 = vmatmul.msk.bf16.gmra.mxu3 %vm544_vm7, %v1212_v1 }
 0x18f   : > { %vm1894_vm8 = vcmp.lt.s32.totalorder %v1356_v2, 0  ;;  %v1895_v3 = vceil.f32 %v1356_v2  ;;  %v1896_v4 = vfloor.f32 %v1356_v2 }
 0x191   : > { %v1897_v5 = vsel %vm1894_vm8, %v1895_v3, %v1896_v4 }
 0x192   : > { %v1898_v6 = vcvt.f32.s32 %v1897_v5  ;;  %v1277_v7 = vpop.f32.mrf.mxu0 }
 0x193   : > { %v1362_v8 = vmax.f32 %v1277_v7, 0.0 }
 0x194   : > { %v1358_v9 = vpack.c.b16 %v1898_v6, %v1898_v6 }
 0x195   : > { %v1363_v10 = vmin.f32 %v1362_v8, 255.0 }
 0x196   : > { %v1359_v11 = vpack.c.b8 %v1358_v9, %v1358_v9 }
 0x197   : > { %vm1899_vm10 = vcmp.lt.s32.totalorder %v1363_v10, 0  ;;  %v1900_v12 = vceil.f32 %v1363_v10  ;;  %v1901_v13 = vfloor.f32 %v1363_v10 }
 0x198   : > { %1361 = vst.msk [vmem:[%s2271_s26] sm:$0x3] %vm1360_vm9, %v1359_v11 }
 0x199   : > { %v1902_v16 = vsel %vm1899_vm10, %v1900_v12, %v1901_v13 }
 0x19a   : > { %v1903_v17 = vcvt.f32.s32 %v1902_v16  ;;  %v1280_v58 = vpop.f32.mrf.mxu0 }
 0x19b   : > { %v1369_v48 = vmax.f32 %v1280_v58, 0.0 }
 0x19c   : > { %v1365_v18 = vpack.c.b16 %v1903_v17, %v1903_v17 }
 0x19d   : > { %v1370_v19 = vmin.f32 %v1369_v48, 255.0  ;;  %1694 = vmatmul.msk.bf16.gmra.mxu3 %vm544_vm7, %v1213_v49 }
 0x19e   : > { %v1366_v20 = vpack.c.b8 %v1365_v18, %v1365_v18 }
 0x19f   : > { %vm1904_vm11 = vcmp.lt.s32.totalorder %v1370_v19, 0  ;;  %v1905_v22 = vceil.f32 %v1370_v19  ;;  %v1906_v23 = vfloor.f32 %v1370_v19 }
 0x1a0   : > { %1695 = vst.msk [vmem:[%s2271_s26 + $0x2] sm:$0x3] %vm1360_vm9, %v1366_v20 }
 0x1a1   : > { %v1907_v24 = vsel %vm1904_vm11, %v1905_v22, %v1906_v23 }
 0x1a2   : > { %v1908_v25 = vcvt.f32.s32 %v1907_v24  ;;  %v1282_v21 = vpop.f32.mrf.mxu0 }
 0x1a3   : > { %v1376_v57 = vmax.f32 %v1282_v21, 0.0 }
 0x1a4   : > { %v1372_v26 = vpack.c.b16 %v1908_v25, %v1908_v25 }
 0x1a5   : > { %v1377_v27 = vmin.f32 %v1376_v57, 255.0 }
 0x1a6   : > { %v1373_v28 = vpack.c.b8 %v1372_v26, %v1372_v26 }
 0x1a7   : > { %vm1909_vm12 = vcmp.lt.s32.totalorder %v1377_v27, 0  ;;  %v1910_v29 = vceil.f32 %v1377_v27  ;;  %v1911_v30 = vfloor.f32 %v1377_v27 }
 0x1a8   : > { %1696 = vst.msk [vmem:[%s2271_s26 + $0x4] sm:$0x3] %vm1360_vm9, %v1373_v28 }
 0x1a9   : > { %v1912_v31 = vsel %vm1909_vm12, %v1910_v29, %v1911_v30 }
 0x1aa   : > { %v1913_v32 = vcvt.f32.s32 %v1912_v31  ;;  %v1285_v33 = vpop.f32.mrf.mxu0  ;;  %v1295_v34 = vpop.f32.mrf.mxu1 }
 0x1ab   : > { %v1383_v35 = vmax.f32 %v1285_v33, 0.0  ;;  %v1411_v36 = vmax.f32 %v1295_v34, 0.0 }
 0x1ac   : > { %v1379_v37 = vpack.c.b16 %v1913_v32, %v1913_v32 }
 0x1ad   : > { %v1384_v38 = vmin.f32 %v1383_v35, 255.0  ;;  %v1412_v39 = vmin.f32 %v1411_v36, 255.0 }
 0x1ae   : > { %v1380_v40 = vpack.c.b8 %v1379_v37, %v1379_v37 }
 0x1af   : > { %vm1914_vm13 = vcmp.lt.s32.totalorder %v1384_v38, 0  ;;  %v1915_v41 = vceil.f32 %v1384_v38  ;;  %v1916_v42 = vfloor.f32 %v1384_v38  ;;  %vm1934_vm14 = vcmp.lt.s32.totalorder %v1412_v39, 0 }
 0x1b0   : > { %1697 = vst.msk [vmem:[%s2271_s26 + $0x6] sm:$0x3] %vm1360_vm9, %v1380_v40  ;;  %v1935_v43 = vceil.f32 %v1412_v39  ;;  %v1936_v44 = vfloor.f32 %v1412_v39 }
 0x1b1   : > { %v1917_v46 = vsel %vm1914_vm13, %v1915_v41, %v1916_v42 }
 0x1b2   : > { %v1918_v47 = vcvt.f32.s32 %v1917_v46  ;;  %v1937_v50 = vsel %vm1934_vm14, %v1935_v43, %v1936_v44  ;;  %v1287_v51 = vpop.f32.mrf.mxu0  ;;  %v1297_v52 = vpop.f32.mrf.mxu1 }
 0x1b3   : > { %v1938_v53 = vcvt.f32.s32 %v1937_v50  ;;  %v1390_v54 = vmax.f32 %v1287_v51, 0.0  ;;  %v1418_v55 = vmax.f32 %v1297_v52, 0.0 }
 0x1b4   : > { %v1386_v56 = vpack.c.b16 %v1918_v47, %v1918_v47 }
 0x1b5   : > { %v1414_v59 = vpack.c.b16 %v1938_v53, %v1938_v53  ;;  %v1391_v45 = vmin.f32 %v1390_v54, 255.0  ;;  %v1419_v60 = vmin.f32 %v1418_v55, 255.0 }
 0x1b6   : > { %v1387_v61 = vpack.c.b8 %v1386_v56, %v1386_v56 }
 0x1b7   : > { %v1415_v62 = vpack.c.b8 %v1414_v59, %v1414_v59  ;;  %vm1919_vm15 = vcmp.lt.s32.totalorder %v1391_v45, 0  ;;  %v1920_v63 = vceil.f32 %v1391_v45  ;;  %v1921_v0 = vfloor.f32 %v1391_v45 }
 0x1b8   : > { %1698 = vst.msk [vmem:[%s2271_s26 + $0x8] sm:$0x3] %vm1360_vm9, %v1387_v61  ;;  %vm1939_vm0 = vcmp.lt.s32.totalorder %v1419_v60, 0  ;;  %v1940_v1 = vceil.f32 %v1419_v60  ;;  %v1941_v2 = vfloor.f32 %v1419_v60 }
 0x1b9   : > { %1702 = vst.msk [vmem:[%s2271_s26 + $0x10] sm:$0x3] %vm1360_vm9, %v1415_v62  ;;  %v1922_v3 = vsel %vm1919_vm15, %v1920_v63, %v1921_v0 }
 0x1ba   : > { %v1923_v4 = vcvt.f32.s32 %v1922_v3  ;;  %v1942_v5 = vsel %vm1939_vm0, %v1940_v1, %v1941_v2  ;;  %v1290_v6 = vpop.f32.mrf.mxu0  ;;  %v1300_v7 = vpop.f32.mrf.mxu1 }
 0x1bb   : > { %v1943_v8 = vcvt.f32.s32 %v1942_v5  ;;  %v1397_v9 = vmax.f32 %v1290_v6, 0.0  ;;  %v1425_v10 = vmax.f32 %v1300_v7, 0.0 }
 0x1bc   : > { %v1393_v11 = vpack.c.b16 %v1923_v4, %v1923_v4 }
 0x1bd   : > { %v1421_v12 = vpack.c.b16 %v1943_v8, %v1943_v8  ;;  %v1398_v13 = vmin.f32 %v1397_v9, 255.0  ;;  %v1426_v14 = vmin.f32 %v1425_v10, 255.0 }
 0x1be   : > { %v1394_v15 = vpack.c.b8 %v1393_v11, %v1393_v11 }
 0x1bf   : > { %v1422_v16 = vpack.c.b8 %v1421_v12, %v1421_v12  ;;  %vm1924_vm1 = vcmp.lt.s32.totalorder %v1398_v13, 0  ;;  %v1925_v17 = vceil.f32 %v1398_v13  ;;  %v1926_v58 = vfloor.f32 %v1398_v13 }
 0x1c0   : > { %1699 = vst.msk [vmem:[%s2271_s26 + $0xa] sm:$0x3] %vm1360_vm9, %v1394_v15  ;;  %vm1944_vm2 = vcmp.lt.s32.totalorder %v1426_v14, 0  ;;  %v1945_v48 = vceil.f32 %v1426_v14  ;;  %v1946_v49 = vfloor.f32 %v1426_v14 }
 0x1c1   : > { %1703 = vst.msk [vmem:[%s2271_s26 + $0x12] sm:$0x3] %vm1360_vm9, %v1422_v16  ;;  %v1927_v18 = vsel %vm1924_vm1, %v1925_v17, %v1926_v58 }
 0x1c2   : > { %v1928_v19 = vcvt.f32.s32 %v1927_v18  ;;  %v1947_v20 = vsel %vm1944_vm2, %v1945_v48, %v1946_v49  ;;  %v1292_v22 = vpop.f32.mrf.mxu0  ;;  %v1302_v23 = vpop.f32.mrf.mxu1 }
 0x1c3   : > { %v1948_v24 = vcvt.f32.s32 %v1947_v20  ;;  %v1404_v25 = vmax.f32 %v1292_v22, 0.0  ;;  %v1432_v21 = vmax.f32 %v1302_v23, 0.0 }
 0x1c4   : > { %v1400_v57 = vpack.c.b16 %v1928_v19, %v1928_v19 }
 0x1c5   : > { %v1428_v26 = vpack.c.b16 %v1948_v24, %v1948_v24  ;;  %v1405_v27 = vmin.f32 %v1404_v25, 255.0  ;;  %v1433_v28 = vmin.f32 %v1432_v21, 255.0 }
 0x1c6   : > { %v1401_v29 = vpack.c.b8 %v1400_v57, %v1400_v57 }
 0x1c7   : > { %v1429_v30 = vpack.c.b8 %v1428_v26, %v1428_v26  ;;  %vm1929_vm3 = vcmp.lt.s32.totalorder %v1405_v27, 0  ;;  %v1930_v31 = vceil.f32 %v1405_v27  ;;  %v1931_v32 = vfloor.f32 %v1405_v27 }
 0x1c8   : > { %1700 = vst.msk [vmem:[%s2271_s26 + $0xc] sm:$0x3] %vm1360_vm9, %v1401_v29  ;;  %vm1949_vm4 = vcmp.lt.s32.totalorder %v1433_v28, 0  ;;  %v1950_v33 = vceil.f32 %v1433_v28  ;;  %v1951_v34 = vfloor.f32 %v1433_v28 }
 0x1c9   : > { %1704 = vst.msk [vmem:[%s2271_s26 + $0x14] sm:$0x3] %vm1360_vm9, %v1429_v30  ;;  %v1932_v35 = vsel %vm1929_vm3, %v1930_v31, %v1931_v32 }
 0x1ca   : > { %v1933_v36 = vcvt.f32.s32 %v1932_v35  ;;  %v1952_v37 = vsel %vm1949_vm4, %v1950_v33, %v1951_v34  ;;  %v1305_v38 = vpop.f32.mrf.mxu1 }
 0x1cb   : > { %v1953_v39 = vcvt.f32.s32 %v1952_v37  ;;  %v1439_v40 = vmax.f32 %v1305_v38, 0.0 }
 0x1cc   : > { %v1407_v41 = vpack.c.b16 %v1933_v36, %v1933_v36 }
 0x1cd   : > { %v1435_v42 = vpack.c.b16 %v1953_v39, %v1953_v39  ;;  %v1440_v43 = vmin.f32 %v1439_v40, 255.0 }
 0x1ce   : > { %v1408_v44 = vpack.c.b8 %v1407_v41, %v1407_v41 }
 0x1cf   : > { %v1436_v46 = vpack.c.b8 %v1435_v42, %v1435_v42  ;;  %vm1954_vm5 = vcmp.lt.s32.totalorder %v1440_v43, 0  ;;  %v1955_v47 = vceil.f32 %v1440_v43  ;;  %v1956_v50 = vfloor.f32 %v1440_v43 }
 0x1d0   : > { %1701 = vst.msk [vmem:[%s2271_s26 + $0xe] sm:$0x3] %vm1360_vm9, %v1408_v44  ;;  %v1315_v51 = vpop.f32.mrf.mxu2 }
 0x1d1   : > { %1705 = vst.msk [vmem:[%s2271_s26 + $0x16] sm:$0x3] %vm1360_vm9, %v1436_v46  ;;  %v1957_v52 = vsel %vm1954_vm5, %v1955_v47, %v1956_v50  ;;  %v1467_v53 = vmax.f32 %v1315_v51, 0.0 }
 0x1d2   : > { %v1958_v54 = vcvt.f32.s32 %v1957_v52  ;;  %v1307_v55 = vpop.f32.mrf.mxu1 }
 0x1d3   : > { %v1468_v56 = vmin.f32 %v1467_v53, 255.0  ;;  %v1446_v59 = vmax.f32 %v1307_v55, 0.0 }
 0x1d4   : > { %v1442_v45 = vpack.c.b16 %v1958_v54, %v1958_v54 }
 0x1d5   : > { %vm1974_vm6 = vcmp.lt.s32.totalorder %v1468_v56, 0  ;;  %v1975_v60 = vceil.f32 %v1468_v56  ;;  %v1976_v61 = vfloor.f32 %v1468_v56  ;;  %v1447_v62 = vmin.f32 %v1446_v59, 255.0 }
 0x1d6   : > { %v1443_v63 = vpack.c.b8 %v1442_v45, %v1442_v45 }
 0x1d7   : > { %v1977_v0 = vsel %vm1974_vm6, %v1975_v60, %v1976_v61  ;;  %vm1959_vm7 = vcmp.lt.s32.totalorder %v1447_v62, 0  ;;  %v1960_v1 = vceil.f32 %v1447_v62  ;;  %v1961_v2 = vfloor.f32 %v1447_v62 }
 0x1d8   : > { %1706 = vst.msk [vmem:[%s2271_s26 + $0x18] sm:$0x3] %vm1360_vm9, %v1443_v63  ;;  %v1978_v3 = vcvt.f32.s32 %v1977_v0  ;;  %v1317_v4 = vpop.f32.mrf.mxu2 }
 0x1d9   : > { %v1962_v5 = vsel %vm1959_vm7, %v1960_v1, %v1961_v2  ;;  %v1474_v6 = vmax.f32 %v1317_v4, 0.0 }
 0x1da   : > { %v1470_v7 = vpack.c.b16 %v1978_v3, %v1978_v3  ;;  %v1963_v8 = vcvt.f32.s32 %v1962_v5  ;;  %v1310_v9 = vpop.f32.mrf.mxu1 }
 0x1db   : > { %v1475_v10 = vmin.f32 %v1474_v6, 255.0  ;;  %v1453_v11 = vmax.f32 %v1310_v9, 0.0 }
 0x1dc   : > { %v1471_v12 = vpack.c.b8 %v1470_v7, %v1470_v7  ;;  %v1449_v13 = vpack.c.b16 %v1963_v8, %v1963_v8 }
 0x1dd   : > { %vm1979_vm8 = vcmp.lt.s32.totalorder %v1475_v10, 0  ;;  %v1980_v14 = vceil.f32 %v1475_v10  ;;  %v1981_v15 = vfloor.f32 %v1475_v10  ;;  %v1454_v16 = vmin.f32 %v1453_v11, 255.0 }
 0x1de   : > { %1710 = vst.msk [vmem:[%s2271_s26 + $0x20] sm:$0x3] %vm1360_vm9, %v1471_v12  ;;  %v1450_v17 = vpack.c.b8 %v1449_v13, %v1449_v13 }
 0x1df   : > { %v1982_v58 = vsel %vm1979_vm8, %v1980_v14, %v1981_v15  ;;  %vm1964_vm10 = vcmp.lt.s32.totalorder %v1454_v16, 0  ;;  %v1965_v48 = vceil.f32 %v1454_v16  ;;  %v1966_v49 = vfloor.f32 %v1454_v16 }
 0x1e0   : > { %1707 = vst.msk [vmem:[%s2271_s26 + $0x1a] sm:$0x3] %vm1360_vm9, %v1450_v17  ;;  %v1983_v18 = vcvt.f32.s32 %v1982_v58  ;;  %v1320_v19 = vpop.f32.mrf.mxu2 }
 0x1e1   : > { %v1967_v20 = vsel %vm1964_vm10, %v1965_v48, %v1966_v49  ;;  %v1481_v22 = vmax.f32 %v1320_v19, 0.0 }
 0x1e2   : > { %v1477_v23 = vpack.c.b16 %v1983_v18, %v1983_v18  ;;  %v1968_v24 = vcvt.f32.s32 %v1967_v20  ;;  %v1312_v25 = vpop.f32.mrf.mxu1 }
 0x1e3   : > { %v1482_v21 = vmin.f32 %v1481_v22, 255.0  ;;  %v1460_v57 = vmax.f32 %v1312_v25, 0.0 }
 0x1e4   : > { %v1478_v26 = vpack.c.b8 %v1477_v23, %v1477_v23  ;;  %v1456_v27 = vpack.c.b16 %v1968_v24, %v1968_v24 }
 0x1e5   : > { %vm1984_vm11 = vcmp.lt.s32.totalorder %v1482_v21, 0  ;;  %v1985_v28 = vceil.f32 %v1482_v21  ;;  %v1986_v29 = vfloor.f32 %v1482_v21  ;;  %v1461_v30 = vmin.f32 %v1460_v57, 255.0 }
 0x1e6   : > { %1711 = vst.msk [vmem:[%s2271_s26 + $0x22] sm:$0x3] %vm1360_vm9, %v1478_v26  ;;  %v1457_v31 = vpack.c.b8 %v1456_v27, %v1456_v27 }
 0x1e7   : > { %v1987_v32 = vsel %vm1984_vm11, %v1985_v28, %v1986_v29  ;;  %vm1969_vm12 = vcmp.lt.s32.totalorder %v1461_v30, 0  ;;  %v1970_v33 = vceil.f32 %v1461_v30  ;;  %v1971_v34 = vfloor.f32 %v1461_v30 }
 0x1e8   : > { %1708 = vst.msk [vmem:[%s2271_s26 + $0x1c] sm:$0x3] %vm1360_vm9, %v1457_v31  ;;  %v1988_v35 = vcvt.f32.s32 %v1987_v32  ;;  %v1322_v36 = vpop.f32.mrf.mxu2 }
 0x1e9   : > { %v1972_v37 = vsel %vm1969_vm12, %v1970_v33, %v1971_v34  ;;  %v1488_v38 = vmax.f32 %v1322_v36, 0.0 }
 0x1ea   : > { %v1484_v39 = vpack.c.b16 %v1988_v35, %v1988_v35  ;;  %v1973_v40 = vcvt.f32.s32 %v1972_v37 }
 0x1eb   : > { %v1489_v41 = vmin.f32 %v1488_v38, 255.0 }
 0x1ec   : > { %v1485_v42 = vpack.c.b8 %v1484_v39, %v1484_v39  ;;  %v1463_v43 = vpack.c.b16 %v1973_v40, %v1973_v40 }
 0x1ed   : > { %vm1989_vm13 = vcmp.lt.s32.totalorder %v1489_v41, 0  ;;  %v1990_v44 = vceil.f32 %v1489_v41  ;;  %v1991_v46 = vfloor.f32 %v1489_v41 }
 0x1ee   : > { %1712 = vst.msk [vmem:[%s2271_s26 + $0x24] sm:$0x3] %vm1360_vm9, %v1485_v42  ;;  %v1464_v47 = vpack.c.b8 %v1463_v43, %v1463_v43 }
 0x1ef   : > { %v1992_v50 = vsel %vm1989_vm13, %v1990_v44, %v1991_v46 }
 0x1f0   : > { %1709 = vst.msk [vmem:[%s2271_s26 + $0x1e] sm:$0x3] %vm1360_vm9, %v1464_v47  ;;  %v1993_v51 = vcvt.f32.s32 %v1992_v50  ;;  %v1325_v52 = vpop.f32.mrf.mxu2  ;;  %v1335_v53 = vpop.f32.mrf.mxu3 }
 0x1f1   : > { %v1495_v54 = vmax.f32 %v1325_v52, 0.0  ;;  %v1523_v55 = vmax.f32 %v1335_v53, 0.0 }
 0x1f2   : > { %v1491_v56 = vpack.c.b16 %v1993_v51, %v1993_v51 }
 0x1f3   : > { %v1496_v59 = vmin.f32 %v1495_v54, 255.0  ;;  %v1524_v45 = vmin.f32 %v1523_v55, 255.0 }
 0x1f4   : > { %v1492_v60 = vpack.c.b8 %v1491_v56, %v1491_v56 }
 0x1f5   : > { %vm1994_vm14 = vcmp.lt.s32.totalorder %v1496_v59, 0  ;;  %v1995_v61 = vceil.f32 %v1496_v59  ;;  %v1996_v62 = vfloor.f32 %v1496_v59  ;;  %vm2014_vm15 = vcmp.lt.s32.totalorder %v1524_v45, 0 }
 0x1f6   : > { %1713 = vst.msk [vmem:[%s2271_s26 + $0x26] sm:$0x3] %vm1360_vm9, %v1492_v60  ;;  %v2015_v63 = vceil.f32 %v1524_v45  ;;  %v2016_v0 = vfloor.f32 %v1524_v45 }
 0x1f7   : > { %v1997_v1 = vsel %vm1994_vm14, %v1995_v61, %v1996_v62 }
 0x1f8   : > { %v1998_v2 = vcvt.f32.s32 %v1997_v1  ;;  %v2017_v3 = vsel %vm2014_vm15, %v2015_v63, %v2016_v0  ;;  %v1327_v4 = vpop.f32.mrf.mxu2  ;;  %v1337_v5 = vpop.f32.mrf.mxu3 }
 0x1f9   : > { %v2018_v6 = vcvt.f32.s32 %v2017_v3  ;;  %v1502_v7 = vmax.f32 %v1327_v4, 0.0  ;;  %v1530_v8 = vmax.f32 %v1337_v5, 0.0 }
 0x1fa   : > { %v1498_v9 = vpack.c.b16 %v1998_v2, %v1998_v2 }
 0x1fb   : > { %v1526_v10 = vpack.c.b16 %v2018_v6, %v2018_v6  ;;  %v1503_v11 = vmin.f32 %v1502_v7, 255.0  ;;  %v1531_v12 = vmin.f32 %v1530_v8, 255.0 }
 0x1fc   : > { %v1499_v13 = vpack.c.b8 %v1498_v9, %v1498_v9 }
 0x1fd   : > { %v1527_v14 = vpack.c.b8 %v1526_v10, %v1526_v10  ;;  %vm1999_vm0 = vcmp.lt.s32.totalorder %v1503_v11, 0  ;;  %v2000_v15 = vceil.f32 %v1503_v11  ;;  %v2001_v16 = vfloor.f32 %v1503_v11 }
 0x1fe   : > { %1714 = vst.msk [vmem:[%s2271_s26 + $0x28] sm:$0x3] %vm1360_vm9, %v1499_v13  ;;  %vm2019_vm1 = vcmp.lt.s32.totalorder %v1531_v12, 0  ;;  %v2020_v17 = vceil.f32 %v1531_v12  ;;  %v2021_v58 = vfloor.f32 %v1531_v12 }
 0x1ff   : > { %1718 = vst.msk [vmem:[%s2271_s26 + $0x30] sm:$0x3] %vm1360_vm9, %v1527_v14  ;;  %v2002_v48 = vsel %vm1999_vm0, %v2000_v15, %v2001_v16 }
 0x200   : > { %v2003_v49 = vcvt.f32.s32 %v2002_v48  ;;  %v2022_v18 = vsel %vm2019_vm1, %v2020_v17, %v2021_v58  ;;  %v1330_v19 = vpop.f32.mrf.mxu2  ;;  %v1340_v20 = vpop.f32.mrf.mxu3 }
 0x201   : > { %v2023_v22 = vcvt.f32.s32 %v2022_v18  ;;  %v1509_v23 = vmax.f32 %v1330_v19, 0.0  ;;  %v1537_v24 = vmax.f32 %v1340_v20, 0.0 }
 0x202   : > { %v1505_v25 = vpack.c.b16 %v2003_v49, %v2003_v49 }
 0x203   : > { %v1533_v21 = vpack.c.b16 %v2023_v22, %v2023_v22  ;;  %v1510_v57 = vmin.f32 %v1509_v23, 255.0  ;;  %v1538_v26 = vmin.f32 %v1537_v24, 255.0 }
 0x204   : > { %v1506_v27 = vpack.c.b8 %v1505_v25, %v1505_v25 }
 0x205   : > { %v1534_v28 = vpack.c.b8 %v1533_v21, %v1533_v21  ;;  %vm2004_vm2 = vcmp.lt.s32.totalorder %v1510_v57, 0  ;;  %v2005_v29 = vceil.f32 %v1510_v57  ;;  %v2006_v30 = vfloor.f32 %v1510_v57 }
 0x206   : > { %1715 = vst.msk [vmem:[%s2271_s26 + $0x2a] sm:$0x3] %vm1360_vm9, %v1506_v27  ;;  %vm2024_vm3 = vcmp.lt.s32.totalorder %v1538_v26, 0  ;;  %v2025_v31 = vceil.f32 %v1538_v26  ;;  %v2026_v32 = vfloor.f32 %v1538_v26 }
 0x207   : > { %1719 = vst.msk [vmem:[%s2271_s26 + $0x32] sm:$0x3] %vm1360_vm9, %v1534_v28  ;;  %v2007_v33 = vsel %vm2004_vm2, %v2005_v29, %v2006_v30 }
 0x208   : > { %v2008_v34 = vcvt.f32.s32 %v2007_v33  ;;  %v2027_v35 = vsel %vm2024_vm3, %v2025_v31, %v2026_v32  ;;  %v1332_v36 = vpop.f32.mrf.mxu2  ;;  %v1342_v37 = vpop.f32.mrf.mxu3 }
 0x209   : > { %v2028_v38 = vcvt.f32.s32 %v2027_v35  ;;  %v1516_v39 = vmax.f32 %v1332_v36, 0.0  ;;  %v1544_v40 = vmax.f32 %v1342_v37, 0.0 }
 0x20a   : > { %v1512_v41 = vpack.c.b16 %v2008_v34, %v2008_v34 }
 0x20b   : > { %v1540_v42 = vpack.c.b16 %v2028_v38, %v2028_v38  ;;  %v1517_v43 = vmin.f32 %v1516_v39, 255.0  ;;  %v1545_v44 = vmin.f32 %v1544_v40, 255.0 }
 0x20c   : > { %v1513_v46 = vpack.c.b8 %v1512_v41, %v1512_v41 }
 0x20d   : > { %v1541_v47 = vpack.c.b8 %v1540_v42, %v1540_v42  ;;  %vm2009_vm4 = vcmp.lt.s32.totalorder %v1517_v43, 0  ;;  %v2010_v50 = vceil.f32 %v1517_v43  ;;  %v2011_v51 = vfloor.f32 %v1517_v43 }
 0x20e   : > { %1716 = vst.msk [vmem:[%s2271_s26 + $0x2c] sm:$0x3] %vm1360_vm9, %v1513_v46  ;;  %vm2029_vm5 = vcmp.lt.s32.totalorder %v1545_v44, 0  ;;  %v2030_v52 = vceil.f32 %v1545_v44  ;;  %v2031_v53 = vfloor.f32 %v1545_v44 }
 0x20f   : > { %1720 = vst.msk [vmem:[%s2271_s26 + $0x34] sm:$0x3] %vm1360_vm9, %v1541_v47  ;;  %v2012_v54 = vsel %vm2009_vm4, %v2010_v50, %v2011_v51 }
 0x210   : > { %v2013_v55 = vcvt.f32.s32 %v2012_v54  ;;  %v2032_v56 = vsel %vm2029_vm5, %v2030_v52, %v2031_v53  ;;  %v1345_v59 = vpop.f32.mrf.mxu3 }
 0x211   : > { %v2033_v45 = vcvt.f32.s32 %v2032_v56  ;;  %v1551_v60 = vmax.f32 %v1345_v59, 0.0 }
 0x212   : > { %v1519_v61 = vpack.c.b16 %v2013_v55, %v2013_v55 }
 0x213   : > { %v1547_v62 = vpack.c.b16 %v2033_v45, %v2033_v45  ;;  %v1552_v63 = vmin.f32 %v1551_v60, 255.0 }
 0x214   : > { %v1520_v0 = vpack.c.b8 %v1519_v61, %v1519_v61 }
 0x215   : > { %v1548_v1 = vpack.c.b8 %v1547_v62, %v1547_v62  ;;  %vm2034_vm6 = vcmp.lt.s32.totalorder %v1552_v63, 0  ;;  %v2035_v2 = vceil.f32 %v1552_v63  ;;  %v2036_v3 = vfloor.f32 %v1552_v63 }
 0x216   : > { %1717 = vst.msk [vmem:[%s2271_s26 + $0x2e] sm:$0x3] %vm1360_vm9, %v1520_v0 }
 0x217   : > { %1721 = vst.msk [vmem:[%s2271_s26 + $0x36] sm:$0x3] %vm1360_vm9, %v1548_v1  ;;  %v2037_v4 = vsel %vm2034_vm6, %v2035_v2, %v2036_v3 }
 0x218   : > { %v2038_v5 = vcvt.f32.s32 %v2037_v4  ;;  %v1347_v6 = vpop.f32.mrf.mxu3 }
 0x219   : > { %v1558_v7 = vmax.f32 %v1347_v6, 0.0 }
 0x21a   : > { %v1554_v8 = vpack.c.b16 %v2038_v5, %v2038_v5 }
 0x21b   : > { %v1559_v9 = vmin.f32 %v1558_v7, 255.0 }
 0x21c   : > { %v1555_v10 = vpack.c.b8 %v1554_v8, %v1554_v8 }
 0x21d   : > { %vm2039_vm7 = vcmp.lt.s32.totalorder %v1559_v9, 0  ;;  %v2040_v11 = vceil.f32 %v1559_v9  ;;  %v2041_v12 = vfloor.f32 %v1559_v9 }
 0x21e   : > { %1722 = vst.msk [vmem:[%s2271_s26 + $0x38] sm:$0x3] %vm1360_vm9, %v1555_v10 }
 0x21f   : > { %v2042_v13 = vsel %vm2039_vm7, %v2040_v11, %v2041_v12 }
 0x220   : > { %v2043_v14 = vcvt.f32.s32 %v2042_v13  ;;  %v1350_v15 = vpop.f32.mrf.mxu3 }
 0x221   : > { %v1565_v16 = vmax.f32 %v1350_v15, 0.0 }
 0x222   : > { %v1561_v17 = vpack.c.b16 %v2043_v14, %v2043_v14 }
 0x223   : > { %v1566_v58 = vmin.f32 %v1565_v16, 255.0 }
 0x224   : > { %v1562_v48 = vpack.c.b8 %v1561_v17, %v1561_v17 }
 0x225   : > { %vm2044_vm8 = vcmp.lt.s32.totalorder %v1566_v58, 0  ;;  %v2045_v49 = vceil.f32 %v1566_v58  ;;  %v2046_v18 = vfloor.f32 %v1566_v58 }
 0x226   : > { %1723 = vst.msk [vmem:[%s2271_s26 + $0x3a] sm:$0x3] %vm1360_vm9, %v1562_v48 }
 0x227   : > { %v2047_v19 = vsel %vm2044_vm8, %v2045_v49, %v2046_v18 }
 0x228   : > { %v2048_v20 = vcvt.f32.s32 %v2047_v19  ;;  %v1352_v22 = vpop.f32.mrf.mxu3 }
 0x229   : > { %v1572_v23 = vmax.f32 %v1352_v22, 0.0 }
 0x22a   : > { %v1568_v24 = vpack.c.b16 %v2048_v20, %v2048_v20 }
 0x22b   : > { %v1573_v25 = vmin.f32 %v1572_v23, 255.0 }
 0x22c   : > { %v1569_v21 = vpack.c.b8 %v1568_v24, %v1568_v24 }
 0x22d   : > { %vm2049_vm10 = vcmp.lt.s32.totalorder %v1573_v25, 0  ;;  %v2050_v57 = vceil.f32 %v1573_v25  ;;  %v2051_v26 = vfloor.f32 %v1573_v25 }
 0x22e   : > { %1724 = vst.msk [vmem:[%s2271_s26 + $0x3c] sm:$0x3] %vm1360_vm9, %v1569_v21 }
 0x22f   : > { %v2052_v27 = vsel %vm2049_vm10, %v2050_v57, %v2051_v26 }
 0x230   : > { %v2053_v28 = vcvt.f32.s32 %v2052_v27 }
 0x232   : > { %v1575_v29 = vpack.c.b16 %v2053_v28, %v2053_v28 }
 0x234   : > { %v1576_v30 = vpack.c.b8 %v1575_v29, %v1575_v29 }
 0x236   : > { %1725 = vst.msk [vmem:[%s2271_s26 + $0x3e] sm:$0x3] %vm1360_vm9, %v1576_v30 }
 0x237 PF: > { %s13_s12 = sadd.s32 1, %s2073_s12  }
 0x238   : > { %p10_p4 = scmp.ge.s32.totalorder %s13_s12, 4  }
 0x23a   :  { %12 = sbr.rel (!%p10_p4) target bundleno = 1 (0x1), region = 93 }

</bundles_post_ra>
